<compile_context>
chip_gen: v5e
topology: v5e:2x2
jax: 0.10.0
libtpu: 0.0.40
codegen_flags: <defaults>
</compile_context>

<pallas_src>
import jax
import jax.numpy as jnp
import numpy as np
from jax.experimental import pallas as pl
from jax.experimental.pallas import tpu as pltpu

L = 64          # input_size == signal length
C1 = 16
C2 = 32
POOL = 8
FC1 = 64
OUT = 16
OUT_PAD = 128   # lane-dense output width (cols 16..127 are zeros, sliced off)
KW = 3
LT = 8          # conv2 L-tile (output positions per tile)
NT = L // LT    # 8 tiles
IN_TILE = LT * C1    # 128 h1 lanes per tile
OUT_TILE = LT * C2   # 256 h2 lanes per tile


# ----------------------------------------------------------------------------- kernel
def _fused_kernel(x_ref, a1_ref, b1_ref, wsub_ref, wmain_ref, wsup_ref, b2_ref,
                  a3_ref, b3_ref, a4_ref, b4_ref, o_ref):
    f32, bf16 = jnp.float32, jnp.bfloat16
    x = x_ref[...].astype(bf16)

    # conv1 (folded banded dense matrix) + bias + ReLU   -> h1: (block, 1024)
    h1 = jnp.dot(x, a1_ref[...], preferred_element_type=f32) + b1_ref[...]
    h1 = jnp.maximum(h1, 0.0).astype(bf16)

    # conv2 as 3 band matmuls per 8-position tile, ReLU, then fused
    # AdaptiveAvgPool1d(8) + flatten + fc1 (folded into A3), accumulated per tile.
    wsub = wsub_ref[...]
    wmain = wmain_ref[...]
    wsup = wsup_ref[...]
    acc3 = jnp.zeros((x.shape[0], FC1), f32)
    for t in range(NT):                                   # static, fully unrolled
        h2_t = jnp.dot(h1[:, t * IN_TILE:(t + 1) * IN_TILE], wmain,
                       preferred_element_type=f32)
        if t > 0:                                         # halo from previous tile
            h2_t += jnp.dot(h1[:, (t - 1) * IN_TILE:t * IN_TILE], wsub,
                            preferred_element_type=f32)
        if t < NT - 1:                                    # halo from next tile
            h2_t += jnp.dot(h1[:, (t + 1) * IN_TILE:(t + 2) * IN_TILE], wsup,
                            preferred_element_type=f32)
        h2_t = jnp.maximum(h2_t + b2_ref[...], 0.0).astype(bf16)   # (block, 256)
        acc3 += jnp.dot(h2_t, a3_ref[t * OUT_TILE:(t + 1) * OUT_TILE, :],
                        preferred_element_type=f32)

    # fc1 bias + ReLU; Dropout(0.1) is identity at inference; fc2 (lane-padded).
    # TODO(synk): training-mode dropout (stochastic masking) not implemented.
    h3 = jnp.maximum(acc3 + b3_ref[...], 0.0).astype(bf16)
    y = jnp.dot(h3, a4_ref[...], preferred_element_type=f32) + b4_ref[...]
    o_ref[...] = y.astype(o_ref.dtype)


# ----------------------------------------------------------------------------- wrapper
def _round_up(n, m):
    return ((n + m - 1) // m) * m


def complex_toy_model_forward(x, folded, *, max_block_rows=256):
    """x: (B, 64) f32, folded: output of fold_params()."""
    A1, B1, Wsub, Wmain, Wsup, B2, A3, B3, A4, B4 = folded
    Bn, D = x.shape
    assert D == L

    # Batch tile: whole batch for tiny batches; otherwise >= 2 grid steps so the
    # "parallel" axis can use both v7x TensorCores; capped for v7x's 64 MiB VMEM.
    if Bn <= 16:
        block, Bp = Bn, Bn
    else:
        block = min(max_block_rows, _round_up((Bn + 1) // 2, 8))
        Bp = _round_up(Bn, block)
    if Bp != Bn:
        x = jnp.pad(x, ((0, Bp - Bn), (0, 0)))
    grid = (Bp // block,)

    # Constant-index weights/biases: resident in VMEM, single-buffered.
    def full(arr):
        return pl.BlockSpec(arr.shape, lambda i: (0,) * arr.ndim,
                            pipeline_mode=pl.Buffered(1))

    flops_per_row = 2 * (L * L * C1 + NT * 3 * IN_TILE * OUT_TILE
                         + L * C2 * FC1 + FC1 * OUT_PAD)
    weight_bytes = sum(int(np.prod(a.shape)) * int(a.dtype.itemsize)
                       for a in (A1, B1, Wsub, Wmain, Wsup, B2, A3, B3, A4, B4))
    cost = pl.CostEstimate(
        flops=int(flops_per_row * Bp),
        transcendentals=0,
        bytes_accessed=int(weight_bytes + Bp * L * 4 + Bp * OUT_PAD * 4))

    out = pl.pallas_call(
        _fused_kernel,
        out_shape=jax.ShapeDtypeStruct((Bp, OUT_PAD), x.dtype),
        grid_spec=pltpu.PrefetchScalarGridSpec(
            num_scalar_prefetch=0,
            grid=grid,
            in_specs=[
                pl.BlockSpec((block, L), lambda i: (i, 0)),   # x tile
                full(A1), full(B1),
                full(Wsub), full(Wmain), full(Wsup), full(B2),
                full(A3), full(B3), full(A4), full(B4),
            ],
            out_specs=pl.BlockSpec((block, OUT_PAD), lambda i: (i, 0)),
        ),
        compiler_params=pltpu.CompilerParams(
            dimension_semantics=("parallel",),
            vmem_limit_bytes=24 * 1024 * 1024,
        ),
        cost_estimate=cost,
    )(x, A1, B1, Wsub, Wmain, Wsup, B2, A3, B3, A4, B4)
    return out[:Bn, :OUT]


# ----------------------------------------------------------------------------- params
def init_params(key):
    """PyTorch-layout parameters (deterministic, uniform +-1/sqrt(fan_in))."""
    ks = jax.random.split(key, 8)

    def u(k, shape, fan_in):
        b = 1.0 / np.sqrt(float(fan_in))
        return jax.random.uniform(k, shape, jnp.float32, -b, b)

    w_c1 = u(ks[0], (C1, 1, KW), 1 * KW)          # Conv1d(1, 16, 3)
    b_c1 = u(ks[1], (C1,), 1 * KW)
    w_c2 = u(ks[2], (C2, C1, KW), C1 * KW)        # Conv1d(16, 32, 3)
    b_c2 = u(ks[3], (C2,), C1 * KW)
    w_f1 = u(ks[4], (FC1, C2 * POOL), C2 * POOL)  # Linear(256, 64)
    b_f1 = u(ks[5], (FC1,), C2 * POOL)
    w_f2 = u(ks[6], (OUT, FC1), FC1)              # Linear(64, 16)
    b_f2 = u(ks[7], (OUT,), FC1)
    return (w_c1, b_c1, w_c2, b_c2, w_f1, b_f1, w_f2, b_f2)


def fold_params(params):
    """Fold conv/pool/flatten structure into banded/dense matrices (exact in f32)."""
    w1, b1, w2, b2, wf1, bf1, wf2, bf2 = [np.asarray(p, np.float32) for p in params]

    # A1: x[b, l_in] -> conv1 pre-activation, feature f = l_out*C1 + c
    A1 = np.zeros((L, L, C1), np.float32)
    for k in range(KW):
        for lo in range(L):
            li = lo + k - 1
            if 0 <= li < L:
                A1[li, lo, :] = w1[:, 0, k]
    A1 = A1.reshape(L, L * C1)
    B1 = np.tile(b1[None, :], (L, 1)).reshape(1, L * C1)

    # conv2 band matrices over 8-position L tiles.
    # Input layout p_in*C1 + i, output layout p_out*C2 + o (positions local to tile).
    Wmain = np.zeros((LT, C1, LT, C2), np.float32)
    Wsub = np.zeros((LT, C1, LT, C2), np.float32)
    Wsup = np.zeros((LT, C1, LT, C2), np.float32)
    for k in range(KW):
        d = k - 1
        for po in range(LT):
            pi = po + d
            if 0 <= pi < LT:
                Wmain[pi, :, po, :] += w2[:, :, k].T          # (i, o)
    Wsub[LT - 1, :, 0, :] = w2[:, :, 0].T    # last pos of previous tile -> first output pos
    Wsup[0, :, LT - 1, :] = w2[:, :, 2].T    # first pos of next tile -> last output pos
    Wmain = Wmain.reshape(IN_TILE, OUT_TILE)
    Wsub = Wsub.reshape(IN_TILE, OUT_TILE)
    Wsup = Wsup.reshape(IN_TILE, OUT_TILE)
    B2 = np.tile(b2[None, :], (LT, 1)).reshape(1, OUT_TILE)

    # A3: AdaptiveAvgPool1d(64->8) + flatten(channel-major) + fc1, folded.
    #     A3[l*C2 + o, q] = wf1[q, o*8 + l//8] / 8
    A3 = np.zeros((L, C2, FC1), np.float32)
    wf1_r = wf1.reshape(FC1, C2, POOL)
    seg = L // POOL
    for l in range(L):
        A3[l, :, :] = wf1_r[:, :, l // seg].T / float(seg)
    A3 = A3.reshape(L * C2, FC1)
    B3 = bf1.reshape(1, FC1)

    # fc2, padded to a 128-lane-dense output block.
    A4 = np.zeros((FC1, OUT_PAD), np.float32)
    A4[:, :OUT] = wf2.T
    B4 = np.zeros((1, OUT_PAD), np.float32)
    B4[0, :OUT] = bf2

    # Weights in bf16 (halves HBM->VMEM DMA, faster MXU path); biases stay f32.
    bf = lambda a: jnp.asarray(a, jnp.bfloat16)
    f32 = lambda a: jnp.asarray(a, jnp.float32)
    return (bf(A1), f32(B1), bf(Wsub), bf(Wmain), bf(Wsup), f32(B2),
            bf(A3), f32(B3), bf(A4), f32(B4))


# ----------------------------------------------------------------------------- reference
def reference_forward(x, params):
    """Pure-JAX mirror of the PyTorch forward (eval mode), f32."""
    w1, b1, w2, b2, wf1, bf1, wf2, bf2 = params

    def conv1d(h, w, b):  # h: (B, Cin, L), w: (Cout, Cin, 3), padding=1
        Lh = h.shape[-1]
        hp = jnp.pad(h, ((0, 0), (0, 0), (1, 1)))
        out = jnp.zeros((h.shape[0], w.shape[0], Lh), h.dtype) + b[None, :, None]
        for k in range(KW):
            out = out + jnp.einsum('oi,bil->bol', w[:, :, k], hp[:, :, k:k + Lh])
        return out

    h = x[:, None, :]                                     # unsqueeze(1)
    h = jnp.maximum(conv1d(h, w1, b1), 0.0)
    h = jnp.maximum(conv1d(h, w2, b2), 0.0)
    Bn = h.shape[0]
    h = h.reshape(Bn, C2, POOL, L // POOL).mean(axis=-1)  # AdaptiveAvgPool1d(8)
    h = h.reshape(Bn, C2 * POOL)                          # view(B, -1)
    h = jnp.maximum(h @ wf1.T + bf1, 0.0)                 # fc1 + ReLU (dropout=identity)
    return h @ wf2.T + bf2                                # fc2


# ----------------------------------------------------------------------------- main
if __name__ == "__main__":
    key = jax.random.PRNGKey(0)
    kx, kp = jax.random.split(key)

    Bn = 8
    x = jax.random.normal(kx, (Bn, L), dtype=jnp.float32)
    params = init_params(kp)
    folded = fold_params(params)

    out = jax.block_until_ready(complex_toy_model_forward(x, folded))

    ref = reference_forward(x, params)
    assert out.shape == (Bn, OUT)
    assert jnp.allclose(out, ref, atol=3e-2, rtol=3e-2), "mismatch vs reference"

    print("KERNEL_OK")
</pallas_src>

<mosaic_0001>
module attributes {stable_mosaic.version = 11 : i64} {
  func.func @_fused_kernel(%arg0: i32, %arg1: memref<8x64xf32, #tpu.memory_space<vmem>>, %arg2: memref<64x1024xbf16, #tpu.memory_space<vmem>>, %arg3: memref<1x1024xf32, #tpu.memory_space<vmem>>, %arg4: memref<128x256xbf16, #tpu.memory_space<vmem>>, %arg5: memref<128x256xbf16, #tpu.memory_space<vmem>>, %arg6: memref<128x256xbf16, #tpu.memory_space<vmem>>, %arg7: memref<1x256xf32, #tpu.memory_space<vmem>>, %arg8: memref<2048x64xbf16, #tpu.memory_space<vmem>>, %arg9: memref<1x64xf32, #tpu.memory_space<vmem>>, %arg10: memref<64x128xbf16, #tpu.memory_space<vmem>>, %arg11: memref<1x128xf32, #tpu.memory_space<vmem>>, %arg12: memref<8x128xf32, #tpu.memory_space<vmem>>) attributes {dimension_semantics = [#tpu.dimension_semantics<parallel>], iteration_bounds = array<i64: 1>, scalar_prefetch = 0 : i64, scratch_operands = 0 : i64, tpu.core_type = #tpu.core_type<tc>, window_params = [{transform_indices = @transform_0, window_bounds = array<i64: 8, 64>}, {pipeline_mode = #tpu.pipeline_mode<synchronous>, transform_indices = @transform_1, window_bounds = array<i64: 64, 1024>}, {pipeline_mode = #tpu.pipeline_mode<synchronous>, transform_indices = @transform_2, window_bounds = array<i64: 1, 1024>}, {pipeline_mode = #tpu.pipeline_mode<synchronous>, transform_indices = @transform_3, window_bounds = array<i64: 128, 256>}, {pipeline_mode = #tpu.pipeline_mode<synchronous>, transform_indices = @transform_4, window_bounds = array<i64: 128, 256>}, {pipeline_mode = #tpu.pipeline_mode<synchronous>, transform_indices = @transform_5, window_bounds = array<i64: 128, 256>}, {pipeline_mode = #tpu.pipeline_mode<synchronous>, transform_indices = @transform_6, window_bounds = array<i64: 1, 256>}, {pipeline_mode = #tpu.pipeline_mode<synchronous>, transform_indices = @transform_7, window_bounds = array<i64: 2048, 64>}, {pipeline_mode = #tpu.pipeline_mode<synchronous>, transform_indices = @transform_8, window_bounds = array<i64: 1, 64>}, {pipeline_mode = #tpu.pipeline_mode<synchronous>, transform_indices = @transform_9, window_bounds = array<i64: 64, 128>}, {pipeline_mode = #tpu.pipeline_mode<synchronous>, transform_indices = @transform_10, window_bounds = array<i64: 1, 128>}, {transform_indices = @transform_11, window_bounds = array<i64: 8, 128>}]} {
    %c0 = arith.constant 0 : index
    %c0_0 = arith.constant 0 : index
    %0 = vector.load %arg1[%c0, %c0_0] : memref<8x64xf32, #tpu.memory_space<vmem>>, vector<8x64xf32>
    %1 = arith.truncf %0 : vector<8x64xf32> to vector<8x64xbf16>
    %c0_1 = arith.constant 0 : index
    %c0_2 = arith.constant 0 : index
    %2 = vector.load %arg2[%c0_1, %c0_2] : memref<64x1024xbf16, #tpu.memory_space<vmem>>, vector<64x1024xbf16>
    %cst = arith.constant dense<0.000000e+00> : vector<8x1024xf32>
    %3 = tpu.matmul %1, %2, %cst {dimension_numbers = #tpu.dot_dimension_numbers<[1], [0], [0], [1], [0, 0, 1, 1], [], []>} : vector<8x64xbf16>, vector<64x1024xbf16>, vector<8x1024xf32> -> vector<8x1024xf32>
    %c0_3 = arith.constant 0 : index
    %c0_4 = arith.constant 0 : index
    %4 = vector.load %arg3[%c0_3, %c0_4] : memref<1x1024xf32, #tpu.memory_space<vmem>>, vector<1x1024xf32>
    %5 = vector.broadcast %4 : vector<1x1024xf32> to vector<8x1024xf32>
    %6 = arith.addf %3, %5 : vector<8x1024xf32>
    %cst_5 = arith.constant 0.000000e+00 : f32
    %7 = vector.broadcast %cst_5 : f32 to vector<8x1024xf32>
    %8 = arith.maximumf %6, %7 : vector<8x1024xf32>
    %9 = arith.truncf %8 : vector<8x1024xf32> to vector<8x1024xbf16>
    %c0_6 = arith.constant 0 : index
    %c0_7 = arith.constant 0 : index
    %10 = vector.load %arg4[%c0_6, %c0_7] : memref<128x256xbf16, #tpu.memory_space<vmem>>, vector<128x256xbf16>
    %c0_8 = arith.constant 0 : index
    %c0_9 = arith.constant 0 : index
    %11 = vector.load %arg5[%c0_8, %c0_9] : memref<128x256xbf16, #tpu.memory_space<vmem>>, vector<128x256xbf16>
    %c0_10 = arith.constant 0 : index
    %c0_11 = arith.constant 0 : index
    %12 = vector.load %arg6[%c0_10, %c0_11] : memref<128x256xbf16, #tpu.memory_space<vmem>>, vector<128x256xbf16>
    %cst_12 = arith.constant 0.000000e+00 : f32
    %13 = vector.broadcast %cst_12 : f32 to vector<8x64xf32>
    %14 = vector.extract_strided_slice %9 {offsets = [0, 0], sizes = [8, 128], strides = [1, 1]} : vector<8x1024xbf16> to vector<8x128xbf16>
    %cst_13 = arith.constant dense<0.000000e+00> : vector<8x256xf32>
    %15 = tpu.matmul %14, %11, %cst_13 {dimension_numbers = #tpu.dot_dimension_numbers<[1], [0], [0], [1], [0, 0, 1, 1], [], []>} : vector<8x128xbf16>, vector<128x256xbf16>, vector<8x256xf32> -> vector<8x256xf32>
    %16 = vector.extract_strided_slice %9 {offsets = [0, 128], sizes = [8, 128], strides = [1, 1]} : vector<8x1024xbf16> to vector<8x128xbf16>
    %cst_14 = arith.constant dense<0.000000e+00> : vector<8x256xf32>
    %17 = tpu.matmul %16, %12, %cst_14 {dimension_numbers = #tpu.dot_dimension_numbers<[1], [0], [0], [1], [0, 0, 1, 1], [], []>} : vector<8x128xbf16>, vector<128x256xbf16>, vector<8x256xf32> -> vector<8x256xf32>
    %18 = arith.addf %15, %17 : vector<8x256xf32>
    %c0_15 = arith.constant 0 : index
    %c0_16 = arith.constant 0 : index
    %19 = vector.load %arg7[%c0_15, %c0_16] : memref<1x256xf32, #tpu.memory_space<vmem>>, vector<1x256xf32>
    %20 = vector.broadcast %19 : vector<1x256xf32> to vector<8x256xf32>
    %21 = arith.addf %18, %20 : vector<8x256xf32>
    %cst_17 = arith.constant 0.000000e+00 : f32
    %22 = vector.broadcast %cst_17 : f32 to vector<8x256xf32>
    %23 = arith.maximumf %21, %22 : vector<8x256xf32>
    %24 = arith.truncf %23 : vector<8x256xf32> to vector<8x256xbf16>
    %c0_18 = arith.constant 0 : index
    %c0_19 = arith.constant 0 : index
    %25 = vector.load %arg8[%c0_18, %c0_19] : memref<2048x64xbf16, #tpu.memory_space<vmem>>, vector<256x64xbf16>
    %cst_20 = arith.constant dense<0.000000e+00> : vector<8x64xf32>
    %26 = tpu.matmul %24, %25, %cst_20 {dimension_numbers = #tpu.dot_dimension_numbers<[1], [0], [0], [1], [0, 0, 1, 1], [], []>} : vector<8x256xbf16>, vector<256x64xbf16>, vector<8x64xf32> -> vector<8x64xf32>
    %27 = arith.addf %13, %26 : vector<8x64xf32>
    %28 = vector.extract_strided_slice %9 {offsets = [0, 128], sizes = [8, 128], strides = [1, 1]} : vector<8x1024xbf16> to vector<8x128xbf16>
    %cst_21 = arith.constant dense<0.000000e+00> : vector<8x256xf32>
    %29 = tpu.matmul %28, %11, %cst_21 {dimension_numbers = #tpu.dot_dimension_numbers<[1], [0], [0], [1], [0, 0, 1, 1], [], []>} : vector<8x128xbf16>, vector<128x256xbf16>, vector<8x256xf32> -> vector<8x256xf32>
    %30 = vector.extract_strided_slice %9 {offsets = [0, 0], sizes = [8, 128], strides = [1, 1]} : vector<8x1024xbf16> to vector<8x128xbf16>
    %cst_22 = arith.constant dense<0.000000e+00> : vector<8x256xf32>
    %31 = tpu.matmul %30, %10, %cst_22 {dimension_numbers = #tpu.dot_dimension_numbers<[1], [0], [0], [1], [0, 0, 1, 1], [], []>} : vector<8x128xbf16>, vector<128x256xbf16>, vector<8x256xf32> -> vector<8x256xf32>
    %32 = arith.addf %29, %31 : vector<8x256xf32>
    %33 = vector.extract_strided_slice %9 {offsets = [0, 256], sizes = [8, 128], strides = [1, 1]} : vector<8x1024xbf16> to vector<8x128xbf16>
    %cst_23 = arith.constant dense<0.000000e+00> : vector<8x256xf32>
    %34 = tpu.matmul %33, %12, %cst_23 {dimension_numbers = #tpu.dot_dimension_numbers<[1], [0], [0], [1], [0, 0, 1, 1], [], []>} : vector<8x128xbf16>, vector<128x256xbf16>, vector<8x256xf32> -> vector<8x256xf32>
    %35 = arith.addf %32, %34 : vector<8x256xf32>
    %c0_24 = arith.constant 0 : index
    %c0_25 = arith.constant 0 : index
    %36 = vector.load %arg7[%c0_24, %c0_25] : memref<1x256xf32, #tpu.memory_space<vmem>>, vector<1x256xf32>
    %37 = vector.broadcast %36 : vector<1x256xf32> to vector<8x256xf32>
    %38 = arith.addf %35, %37 : vector<8x256xf32>
    %cst_26 = arith.constant 0.000000e+00 : f32
    %39 = vector.broadcast %cst_26 : f32 to vector<8x256xf32>
    %40 = arith.maximumf %38, %39 : vector<8x256xf32>
    %41 = arith.truncf %40 : vector<8x256xf32> to vector<8x256xbf16>
    %c256 = arith.constant 256 : index
    %c0_27 = arith.constant 0 : index
    %42 = vector.load %arg8[%c256, %c0_27] : memref<2048x64xbf16, #tpu.memory_space<vmem>>, vector<256x64xbf16>
    %cst_28 = arith.constant dense<0.000000e+00> : vector<8x64xf32>
    %43 = tpu.matmul %41, %42, %cst_28 {dimension_numbers = #tpu.dot_dimension_numbers<[1], [0], [0], [1], [0, 0, 1, 1], [], []>} : vector<8x256xbf16>, vector<256x64xbf16>, vector<8x64xf32> -> vector<8x64xf32>
    %44 = arith.addf %27, %43 : vector<8x64xf32>
    %45 = vector.extract_strided_slice %9 {offsets = [0, 256], sizes = [8, 128], strides = [1, 1]} : vector<8x1024xbf16> to vector<8x128xbf16>
    %cst_29 = arith.constant dense<0.000000e+00> : vector<8x256xf32>
    %46 = tpu.matmul %45, %11, %cst_29 {dimension_numbers = #tpu.dot_dimension_numbers<[1], [0], [0], [1], [0, 0, 1, 1], [], []>} : vector<8x128xbf16>, vector<128x256xbf16>, vector<8x256xf32> -> vector<8x256xf32>
    %47 = vector.extract_strided_slice %9 {offsets = [0, 128], sizes = [8, 128], strides = [1, 1]} : vector<8x1024xbf16> to vector<8x128xbf16>
    %cst_30 = arith.constant dense<0.000000e+00> : vector<8x256xf32>
    %48 = tpu.matmul %47, %10, %cst_30 {dimension_numbers = #tpu.dot_dimension_numbers<[1], [0], [0], [1], [0, 0, 1, 1], [], []>} : vector<8x128xbf16>, vector<128x256xbf16>, vector<8x256xf32> -> vector<8x256xf32>
    %49 = arith.addf %46, %48 : vector<8x256xf32>
    %50 = vector.extract_strided_slice %9 {offsets = [0, 384], sizes = [8, 128], strides = [1, 1]} : vector<8x1024xbf16> to vector<8x128xbf16>
    %cst_31 = arith.constant dense<0.000000e+00> : vector<8x256xf32>
    %51 = tpu.matmul %50, %12, %cst_31 {dimension_numbers = #tpu.dot_dimension_numbers<[1], [0], [0], [1], [0, 0, 1, 1], [], []>} : vector<8x128xbf16>, vector<128x256xbf16>, vector<8x256xf32> -> vector<8x256xf32>
    %52 = arith.addf %49, %51 : vector<8x256xf32>
    %c0_32 = arith.constant 0 : index
    %c0_33 = arith.constant 0 : index
    %53 = vector.load %arg7[%c0_32, %c0_33] : memref<1x256xf32, #tpu.memory_space<vmem>>, vector<1x256xf32>
    %54 = vector.broadcast %53 : vector<1x256xf32> to vector<8x256xf32>
    %55 = arith.addf %52, %54 : vector<8x256xf32>
    %cst_34 = arith.constant 0.000000e+00 : f32
    %56 = vector.broadcast %cst_34 : f32 to vector<8x256xf32>
    %57 = arith.maximumf %55, %56 : vector<8x256xf32>
    %58 = arith.truncf %57 : vector<8x256xf32> to vector<8x256xbf16>
    %c512 = arith.constant 512 : index
    %c0_35 = arith.constant 0 : index
    %59 = vector.load %arg8[%c512, %c0_35] : memref<2048x64xbf16, #tpu.memory_space<vmem>>, vector<256x64xbf16>
    %cst_36 = arith.constant dense<0.000000e+00> : vector<8x64xf32>
    %60 = tpu.matmul %58, %59, %cst_36 {dimension_numbers = #tpu.dot_dimension_numbers<[1], [0], [0], [1], [0, 0, 1, 1], [], []>} : vector<8x256xbf16>, vector<256x64xbf16>, vector<8x64xf32> -> vector<8x64xf32>
    %61 = arith.addf %44, %60 : vector<8x64xf32>
    %62 = vector.extract_strided_slice %9 {offsets = [0, 384], sizes = [8, 128], strides = [1, 1]} : vector<8x1024xbf16> to vector<8x128xbf16>
    %cst_37 = arith.constant dense<0.000000e+00> : vector<8x256xf32>
    %63 = tpu.matmul %62, %11, %cst_37 {dimension_numbers = #tpu.dot_dimension_numbers<[1], [0], [0], [1], [0, 0, 1, 1], [], []>} : vector<8x128xbf16>, vector<128x256xbf16>, vector<8x256xf32> -> vector<8x256xf32>
    %64 = vector.extract_strided_slice %9 {offsets = [0, 256], sizes = [8, 128], strides = [1, 1]} : vector<8x1024xbf16> to vector<8x128xbf16>
    %cst_38 = arith.constant dense<0.000000e+00> : vector<8x256xf32>
    %65 = tpu.matmul %64, %10, %cst_38 {dimension_numbers = #tpu.dot_dimension_numbers<[1], [0], [0], [1], [0, 0, 1, 1], [], []>} : vector<8x128xbf16>, vector<128x256xbf16>, vector<8x256xf32> -> vector<8x256xf32>
    %66 = arith.addf %63, %65 : vector<8x256xf32>
    %67 = vector.extract_strided_slice %9 {offsets = [0, 512], sizes = [8, 128], strides = [1, 1]} : vector<8x1024xbf16> to vector<8x128xbf16>
    %cst_39 = arith.constant dense<0.000000e+00> : vector<8x256xf32>
    %68 = tpu.matmul %67, %12, %cst_39 {dimension_numbers = #tpu.dot_dimension_numbers<[1], [0], [0], [1], [0, 0, 1, 1], [], []>} : vector<8x128xbf16>, vector<128x256xbf16>, vector<8x256xf32> -> vector<8x256xf32>
    %69 = arith.addf %66, %68 : vector<8x256xf32>
    %c0_40 = arith.constant 0 : index
    %c0_41 = arith.constant 0 : index
    %70 = vector.load %arg7[%c0_40, %c0_41] : memref<1x256xf32, #tpu.memory_space<vmem>>, vector<1x256xf32>
    %71 = vector.broadcast %70 : vector<1x256xf32> to vector<8x256xf32>
    %72 = arith.addf %69, %71 : vector<8x256xf32>
    %cst_42 = arith.constant 0.000000e+00 : f32
    %73 = vector.broadcast %cst_42 : f32 to vector<8x256xf32>
    %74 = arith.maximumf %72, %73 : vector<8x256xf32>
    %75 = arith.truncf %74 : vector<8x256xf32> to vector<8x256xbf16>
    %c768 = arith.constant 768 : index
    %c0_43 = arith.constant 0 : index
    %76 = vector.load %arg8[%c768, %c0_43] : memref<2048x64xbf16, #tpu.memory_space<vmem>>, vector<256x64xbf16>
    %cst_44 = arith.constant dense<0.000000e+00> : vector<8x64xf32>
    %77 = tpu.matmul %75, %76, %cst_44 {dimension_numbers = #tpu.dot_dimension_numbers<[1], [0], [0], [1], [0, 0, 1, 1], [], []>} : vector<8x256xbf16>, vector<256x64xbf16>, vector<8x64xf32> -> vector<8x64xf32>
    %78 = arith.addf %61, %77 : vector<8x64xf32>
    %79 = vector.extract_strided_slice %9 {offsets = [0, 512], sizes = [8, 128], strides = [1, 1]} : vector<8x1024xbf16> to vector<8x128xbf16>
    %cst_45 = arith.constant dense<0.000000e+00> : vector<8x256xf32>
    %80 = tpu.matmul %79, %11, %cst_45 {dimension_numbers = #tpu.dot_dimension_numbers<[1], [0], [0], [1], [0, 0, 1, 1], [], []>} : vector<8x128xbf16>, vector<128x256xbf16>, vector<8x256xf32> -> vector<8x256xf32>
    %81 = vector.extract_strided_slice %9 {offsets = [0, 384], sizes = [8, 128], strides = [1, 1]} : vector<8x1024xbf16> to vector<8x128xbf16>
    %cst_46 = arith.constant dense<0.000000e+00> : vector<8x256xf32>
    %82 = tpu.matmul %81, %10, %cst_46 {dimension_numbers = #tpu.dot_dimension_numbers<[1], [0], [0], [1], [0, 0, 1, 1], [], []>} : vector<8x128xbf16>, vector<128x256xbf16>, vector<8x256xf32> -> vector<8x256xf32>
    %83 = arith.addf %80, %82 : vector<8x256xf32>
    %84 = vector.extract_strided_slice %9 {offsets = [0, 640], sizes = [8, 128], strides = [1, 1]} : vector<8x1024xbf16> to vector<8x128xbf16>
    %cst_47 = arith.constant dense<0.000000e+00> : vector<8x256xf32>
    %85 = tpu.matmul %84, %12, %cst_47 {dimension_numbers = #tpu.dot_dimension_numbers<[1], [0], [0], [1], [0, 0, 1, 1], [], []>} : vector<8x128xbf16>, vector<128x256xbf16>, vector<8x256xf32> -> vector<8x256xf32>
    %86 = arith.addf %83, %85 : vector<8x256xf32>
    %c0_48 = arith.constant 0 : index
    %c0_49 = arith.constant 0 : index
    %87 = vector.load %arg7[%c0_48, %c0_49] : memref<1x256xf32, #tpu.memory_space<vmem>>, vector<1x256xf32>
    %88 = vector.broadcast %87 : vector<1x256xf32> to vector<8x256xf32>
    %89 = arith.addf %86, %88 : vector<8x256xf32>
    %cst_50 = arith.constant 0.000000e+00 : f32
    %90 = vector.broadcast %cst_50 : f32 to vector<8x256xf32>
    %91 = arith.maximumf %89, %90 : vector<8x256xf32>
    %92 = arith.truncf %91 : vector<8x256xf32> to vector<8x256xbf16>
    %c1024 = arith.constant 1024 : index
    %c0_51 = arith.constant 0 : index
    %93 = vector.load %arg8[%c1024, %c0_51] : memref<2048x64xbf16, #tpu.memory_space<vmem>>, vector<256x64xbf16>
    %cst_52 = arith.constant dense<0.000000e+00> : vector<8x64xf32>
    %94 = tpu.matmul %92, %93, %cst_52 {dimension_numbers = #tpu.dot_dimension_numbers<[1], [0], [0], [1], [0, 0, 1, 1], [], []>} : vector<8x256xbf16>, vector<256x64xbf16>, vector<8x64xf32> -> vector<8x64xf32>
    %95 = arith.addf %78, %94 : vector<8x64xf32>
    %96 = vector.extract_strided_slice %9 {offsets = [0, 640], sizes = [8, 128], strides = [1, 1]} : vector<8x1024xbf16> to vector<8x128xbf16>
    %cst_53 = arith.constant dense<0.000000e+00> : vector<8x256xf32>
    %97 = tpu.matmul %96, %11, %cst_53 {dimension_numbers = #tpu.dot_dimension_numbers<[1], [0], [0], [1], [0, 0, 1, 1], [], []>} : vector<8x128xbf16>, vector<128x256xbf16>, vector<8x256xf32> -> vector<8x256xf32>
    %98 = vector.extract_strided_slice %9 {offsets = [0, 512], sizes = [8, 128], strides = [1, 1]} : vector<8x1024xbf16> to vector<8x128xbf16>
    %cst_54 = arith.constant dense<0.000000e+00> : vector<8x256xf32>
    %99 = tpu.matmul %98, %10, %cst_54 {dimension_numbers = #tpu.dot_dimension_numbers<[1], [0], [0], [1], [0, 0, 1, 1], [], []>} : vector<8x128xbf16>, vector<128x256xbf16>, vector<8x256xf32> -> vector<8x256xf32>
    %100 = arith.addf %97, %99 : vector<8x256xf32>
    %101 = vector.extract_strided_slice %9 {offsets = [0, 768], sizes = [8, 128], strides = [1, 1]} : vector<8x1024xbf16> to vector<8x128xbf16>
    %cst_55 = arith.constant dense<0.000000e+00> : vector<8x256xf32>
    %102 = tpu.matmul %101, %12, %cst_55 {dimension_numbers = #tpu.dot_dimension_numbers<[1], [0], [0], [1], [0, 0, 1, 1], [], []>} : vector<8x128xbf16>, vector<128x256xbf16>, vector<8x256xf32> -> vector<8x256xf32>
    %103 = arith.addf %100, %102 : vector<8x256xf32>
    %c0_56 = arith.constant 0 : index
    %c0_57 = arith.constant 0 : index
    %104 = vector.load %arg7[%c0_56, %c0_57] : memref<1x256xf32, #tpu.memory_space<vmem>>, vector<1x256xf32>
    %105 = vector.broadcast %104 : vector<1x256xf32> to vector<8x256xf32>
    %106 = arith.addf %103, %105 : vector<8x256xf32>
    %cst_58 = arith.constant 0.000000e+00 : f32
    %107 = vector.broadcast %cst_58 : f32 to vector<8x256xf32>
    %108 = arith.maximumf %106, %107 : vector<8x256xf32>
    %109 = arith.truncf %108 : vector<8x256xf32> to vector<8x256xbf16>
    %c1280 = arith.constant 1280 : index
    %c0_59 = arith.constant 0 : index
    %110 = vector.load %arg8[%c1280, %c0_59] : memref<2048x64xbf16, #tpu.memory_space<vmem>>, vector<256x64xbf16>
    %cst_60 = arith.constant dense<0.000000e+00> : vector<8x64xf32>
    %111 = tpu.matmul %109, %110, %cst_60 {dimension_numbers = #tpu.dot_dimension_numbers<[1], [0], [0], [1], [0, 0, 1, 1], [], []>} : vector<8x256xbf16>, vector<256x64xbf16>, vector<8x64xf32> -> vector<8x64xf32>
    %112 = arith.addf %95, %111 : vector<8x64xf32>
    %113 = vector.extract_strided_slice %9 {offsets = [0, 768], sizes = [8, 128], strides = [1, 1]} : vector<8x1024xbf16> to vector<8x128xbf16>
    %cst_61 = arith.constant dense<0.000000e+00> : vector<8x256xf32>
    %114 = tpu.matmul %113, %11, %cst_61 {dimension_numbers = #tpu.dot_dimension_numbers<[1], [0], [0], [1], [0, 0, 1, 1], [], []>} : vector<8x128xbf16>, vector<128x256xbf16>, vector<8x256xf32> -> vector<8x256xf32>
    %115 = vector.extract_strided_slice %9 {offsets = [0, 640], sizes = [8, 128], strides = [1, 1]} : vector<8x1024xbf16> to vector<8x128xbf16>
    %cst_62 = arith.constant dense<0.000000e+00> : vector<8x256xf32>
    %116 = tpu.matmul %115, %10, %cst_62 {dimension_numbers = #tpu.dot_dimension_numbers<[1], [0], [0], [1], [0, 0, 1, 1], [], []>} : vector<8x128xbf16>, vector<128x256xbf16>, vector<8x256xf32> -> vector<8x256xf32>
    %117 = arith.addf %114, %116 : vector<8x256xf32>
    %118 = vector.extract_strided_slice %9 {offsets = [0, 896], sizes = [8, 128], strides = [1, 1]} : vector<8x1024xbf16> to vector<8x128xbf16>
    %cst_63 = arith.constant dense<0.000000e+00> : vector<8x256xf32>
    %119 = tpu.matmul %118, %12, %cst_63 {dimension_numbers = #tpu.dot_dimension_numbers<[1], [0], [0], [1], [0, 0, 1, 1], [], []>} : vector<8x128xbf16>, vector<128x256xbf16>, vector<8x256xf32> -> vector<8x256xf32>
    %120 = arith.addf %117, %119 : vector<8x256xf32>
    %c0_64 = arith.constant 0 : index
    %c0_65 = arith.constant 0 : index
    %121 = vector.load %arg7[%c0_64, %c0_65] : memref<1x256xf32, #tpu.memory_space<vmem>>, vector<1x256xf32>
    %122 = vector.broadcast %121 : vector<1x256xf32> to vector<8x256xf32>
    %123 = arith.addf %120, %122 : vector<8x256xf32>
    %cst_66 = arith.constant 0.000000e+00 : f32
    %124 = vector.broadcast %cst_66 : f32 to vector<8x256xf32>
    %125 = arith.maximumf %123, %124 : vector<8x256xf32>
    %126 = arith.truncf %125 : vector<8x256xf32> to vector<8x256xbf16>
    %c1536 = arith.constant 1536 : index
    %c0_67 = arith.constant 0 : index
    %127 = vector.load %arg8[%c1536, %c0_67] : memref<2048x64xbf16, #tpu.memory_space<vmem>>, vector<256x64xbf16>
    %cst_68 = arith.constant dense<0.000000e+00> : vector<8x64xf32>
    %128 = tpu.matmul %126, %127, %cst_68 {dimension_numbers = #tpu.dot_dimension_numbers<[1], [0], [0], [1], [0, 0, 1, 1], [], []>} : vector<8x256xbf16>, vector<256x64xbf16>, vector<8x64xf32> -> vector<8x64xf32>
    %129 = arith.addf %112, %128 : vector<8x64xf32>
    %130 = vector.extract_strided_slice %9 {offsets = [0, 896], sizes = [8, 128], strides = [1, 1]} : vector<8x1024xbf16> to vector<8x128xbf16>
    %cst_69 = arith.constant dense<0.000000e+00> : vector<8x256xf32>
    %131 = tpu.matmul %130, %11, %cst_69 {dimension_numbers = #tpu.dot_dimension_numbers<[1], [0], [0], [1], [0, 0, 1, 1], [], []>} : vector<8x128xbf16>, vector<128x256xbf16>, vector<8x256xf32> -> vector<8x256xf32>
    %132 = vector.extract_strided_slice %9 {offsets = [0, 768], sizes = [8, 128], strides = [1, 1]} : vector<8x1024xbf16> to vector<8x128xbf16>
    %cst_70 = arith.constant dense<0.000000e+00> : vector<8x256xf32>
    %133 = tpu.matmul %132, %10, %cst_70 {dimension_numbers = #tpu.dot_dimension_numbers<[1], [0], [0], [1], [0, 0, 1, 1], [], []>} : vector<8x128xbf16>, vector<128x256xbf16>, vector<8x256xf32> -> vector<8x256xf32>
    %134 = arith.addf %131, %133 : vector<8x256xf32>
    %c0_71 = arith.constant 0 : index
    %c0_72 = arith.constant 0 : index
    %135 = vector.load %arg7[%c0_71, %c0_72] : memref<1x256xf32, #tpu.memory_space<vmem>>, vector<1x256xf32>
    %136 = vector.broadcast %135 : vector<1x256xf32> to vector<8x256xf32>
    %137 = arith.addf %134, %136 : vector<8x256xf32>
    %cst_73 = arith.constant 0.000000e+00 : f32
    %138 = vector.broadcast %cst_73 : f32 to vector<8x256xf32>
    %139 = arith.maximumf %137, %138 : vector<8x256xf32>
    %140 = arith.truncf %139 : vector<8x256xf32> to vector<8x256xbf16>
    %c1792 = arith.constant 1792 : index
    %c0_74 = arith.constant 0 : index
    %141 = vector.load %arg8[%c1792, %c0_74] : memref<2048x64xbf16, #tpu.memory_space<vmem>>, vector<256x64xbf16>
    %cst_75 = arith.constant dense<0.000000e+00> : vector<8x64xf32>
    %142 = tpu.matmul %140, %141, %cst_75 {dimension_numbers = #tpu.dot_dimension_numbers<[1], [0], [0], [1], [0, 0, 1, 1], [], []>} : vector<8x256xbf16>, vector<256x64xbf16>, vector<8x64xf32> -> vector<8x64xf32>
    %143 = arith.addf %129, %142 : vector<8x64xf32>
    %c0_76 = arith.constant 0 : index
    %c0_77 = arith.constant 0 : index
    %144 = vector.load %arg9[%c0_76, %c0_77] : memref<1x64xf32, #tpu.memory_space<vmem>>, vector<1x64xf32>
    %145 = vector.broadcast %144 : vector<1x64xf32> to vector<8x64xf32>
    %146 = arith.addf %143, %145 : vector<8x64xf32>
    %cst_78 = arith.constant 0.000000e+00 : f32
    %147 = vector.broadcast %cst_78 : f32 to vector<8x64xf32>
    %148 = arith.maximumf %146, %147 : vector<8x64xf32>
    %149 = arith.truncf %148 : vector<8x64xf32> to vector<8x64xbf16>
    %c0_79 = arith.constant 0 : index
    %c0_80 = arith.constant 0 : index
    %150 = vector.load %arg10[%c0_79, %c0_80] : memref<64x128xbf16, #tpu.memory_space<vmem>>, vector<64x128xbf16>
    %cst_81 = arith.constant dense<0.000000e+00> : vector<8x128xf32>
    %151 = tpu.matmul %149, %150, %cst_81 {dimension_numbers = #tpu.dot_dimension_numbers<[1], [0], [0], [1], [0, 0, 1, 1], [], []>} : vector<8x64xbf16>, vector<64x128xbf16>, vector<8x128xf32> -> vector<8x128xf32>
    %c0_82 = arith.constant 0 : index
    %c0_83 = arith.constant 0 : index
    %152 = vector.load %arg11[%c0_82, %c0_83] : memref<1x128xf32, #tpu.memory_space<vmem>>, vector<1x128xf32>
    %153 = vector.broadcast %152 : vector<1x128xf32> to vector<8x128xf32>
    %154 = arith.addf %151, %153 : vector<8x128xf32>
    %c0_84 = arith.constant 0 : index
    %c0_85 = arith.constant 0 : index
    %155 = vector.load %arg12[%c0_84, %c0_85] : memref<8x128xf32, #tpu.memory_space<vmem>>, vector<8x128xf32>
    tpu.vector_store %arg12[%c0_84, %c0_85], %154 {strides = array<i32>} : memref<8x128xf32, #tpu.memory_space<vmem>>, vector<8x128xf32>,
    return
  }
  func.func @transform_0(%arg0: i32) -> (i32, i32) {
    %c0_i32 = arith.constant 0 : i32
    %c0_i32_0 = arith.constant 0 : i32
    return %arg0, %c0_i32 : i32, i32
  }
  func.func @transform_1(%arg0: i32) -> (i32, i32) {
    %c0_i32 = arith.constant 0 : i32
    %c0_i32_0 = arith.constant 0 : i32
    %c0_i32_1 = arith.constant 0 : i32
    return %c0_i32, %c0_i32_0 : i32, i32
  }
  func.func @transform_2(%arg0: i32) -> (i32, i32) {
    %c0_i32 = arith.constant 0 : i32
    %c0_i32_0 = arith.constant 0 : i32
    %c0_i32_1 = arith.constant 0 : i32
    return %c0_i32, %c0_i32_0 : i32, i32
  }
  func.func @transform_3(%arg0: i32) -> (i32, i32) {
    %c0_i32 = arith.constant 0 : i32
    %c0_i32_0 = arith.constant 0 : i32
    %c0_i32_1 = arith.constant 0 : i32
    return %c0_i32, %c0_i32_0 : i32, i32
  }
  func.func @transform_4(%arg0: i32) -> (i32, i32) {
    %c0_i32 = arith.constant 0 : i32
    %c0_i32_0 = arith.constant 0 : i32
    %c0_i32_1 = arith.constant 0 : i32
    return %c0_i32, %c0_i32_0 : i32, i32
  }
  func.func @transform_5(%arg0: i32) -> (i32, i32) {
    %c0_i32 = arith.constant 0 : i32
    %c0_i32_0 = arith.constant 0 : i32
    %c0_i32_1 = arith.constant 0 : i32
    return %c0_i32, %c0_i32_0 : i32, i32
  }
  func.func @transform_6(%arg0: i32) -> (i32, i32) {
    %c0_i32 = arith.constant 0 : i32
    %c0_i32_0 = arith.constant 0 : i32
    %c0_i32_1 = arith.constant 0 : i32
    return %c0_i32, %c0_i32_0 : i32, i32
  }
  func.func @transform_7(%arg0: i32) -> (i32, i32) {
    %c0_i32 = arith.constant 0 : i32
    %c0_i32_0 = arith.constant 0 : i32
    %c0_i32_1 = arith.constant 0 : i32
    return %c0_i32, %c0_i32_0 : i32, i32
  }
  func.func @transform_8(%arg0: i32) -> (i32, i32) {
    %c0_i32 = arith.constant 0 : i32
    %c0_i32_0 = arith.constant 0 : i32
    %c0_i32_1 = arith.constant 0 : i32
    return %c0_i32, %c0_i32_0 : i32, i32
  }
  func.func @transform_9(%arg0: i32) -> (i32, i32) {
    %c0_i32 = arith.constant 0 : i32
    %c0_i32_0 = arith.constant 0 : i32
    %c0_i32_1 = arith.constant 0 : i32
    return %c0_i32, %c0_i32_0 : i32, i32
  }
  func.func @transform_10(%arg0: i32) -> (i32, i32) {
    %c0_i32 = arith.constant 0 : i32
    %c0_i32_0 = arith.constant 0 : i32
    %c0_i32_1 = arith.constant 0 : i32
    return %c0_i32, %c0_i32_0 : i32, i32
  }
  func.func @transform_11(%arg0: i32) -> (i32, i32) {
    %c0_i32 = arith.constant 0 : i32
    %c0_i32_0 = arith.constant 0 : i32
    return %arg0, %c0_i32 : i32, i32
  }
}

</mosaic_0001>

<bundles_post_ra>
// kernel: tpu_custom_call.1
= control target key start
LH: loop header
LB: loop body
LE: loop exit
PB: predicated region body
PF: predicated region fallthrough
CT: control target
= control target key end

     0   :  { %vm252_vm0 = vcmask 523264   ;;  %s5316_s0 = inlined_call_operand.vmem [shape: f32[8,64], index: 0, kind: input, shape index: {}]   ;;  %s5317_s1 = inlined_call_operand.vmem [shape: bf16[64,1024], index: 1, kind: input, shape index: {}]   ;;  %s5318_s2 = inlined_call_operand.vmem [shape: f32[1,1024], index: 2, kind: input, shape index: {}]   ;;  %s5319_s3 = inlined_call_operand.vmem [shape: bf16[128,256], index: 3, kind: input, shape index: {}]   ;;  %s5320_s4 = inlined_call_operand.vmem [shape: bf16[128,256], index: 4, kind: input, shape index: {}]   ;;  %s5321_s5 = inlined_call_operand.vmem [shape: bf16[128,256], index: 5, kind: input, shape index: {}]   ;;  %s5322_s6 = inlined_call_operand.vmem [shape: f32[1,256], index: 6, kind: input, shape index: {}]   ;;  %s5323_s7 = inlined_call_operand.vmem [shape: bf16[2048,64], index: 7, kind: input, shape index: {}]   ;;  %s5324_s8 = inlined_call_operand.vmem [shape: f32[1,64], index: 8, kind: input, shape index: {}]   ;;  %s5325_s9 = inlined_call_operand.vmem [shape: bf16[64,128], index: 9, kind: input, shape index: {}]   ;;  %s5326_s10 = inlined_call_operand.vmem [shape: f32[1,128], index: 10, kind: input, shape index: {}]   ;;  %s5327_s11 = inlined_call_operand.hbm [shape: f32[8,128], index: 11, kind: output, shape index: {}]  }
   0x1   :  { %v2726_v0 = vld [vmem:[%s5317_s1 + $0xc0] sm:$0xf]  ;;  %v3509_v2 = vld [vmem:[%s5317_s1 + $0xc4] sm:$0xf]  ;;  %v2734_v16 = vld [vmem:[%s5317_s1 + $0xc8] sm:$0xf] }
   0x2   :  { %v3513_v1 = vld [vmem:[%s5317_s1 + $0xdc] sm:$0xf0]  ;;  %v2728_v4 = vld [vmem:[%s5317_s1 + $0xe0] sm:$0xf0]  ;;  %v3514_v18 = vld [vmem:[%s5317_s1 + $0xe4] sm:$0xf0] }
   0x3   :  { %v2727_v3 = vor.u32 %v3513_v1, %v2726_v0  ;;  %v2694_v5 = vld [vmem:[%s5317_s1 + $0x80] sm:$0xf]  ;;  %v2731_v7 = vor.u32 %v3509_v2, %v2728_v4  ;;  %v3501_v8 = vld [vmem:[%s5317_s1 + $0x84] sm:$0xf]  ;;  %v3510_v19 = vld [vmem:[%s5317_s1 + $0xcc] sm:$0xf]  ;;  %v2735_v22 = vor.u32 %v3514_v18, %v2734_v16 }
   0x4   :  { %v3505_v6 = vld [vmem:[%s5317_s1 + $0x9c] sm:$0xf0]  ;;  %v2696_v9 = vld [vmem:[%s5317_s1 + $0xa0] sm:$0xf0]  ;;  %v2736_v20 = vld [vmem:[%s5317_s1 + $0xe8] sm:$0xf0] }
   0x5   :  { %260 = vmatpush.bf16.msra.mxu0 %v2727_v3  ;;  %v2695_v10 = vor.u32 %v3505_v6, %v2694_v5  ;;  %273 = vmatpush.bf16.msra.mxu1 %v2731_v7  ;;  %v2699_v11 = vor.u32 %v3501_v8, %v2696_v9  ;;  %v2662_v12 = vld [vmem:[%s5317_s1 + $0x40] sm:$0xf]  ;;  %v3493_v14 = vld [vmem:[%s5317_s1 + $0x44] sm:$0xf]  ;;  %v2739_v23 = vor.u32 %v3510_v19, %v2736_v20  ;;  %v2702_v24 = vld [vmem:[%s5317_s1 + $0x88] sm:$0xf] }
   0x6   :  { %v3497_v13 = vld [vmem:[%s5317_s1 + $0x5c] sm:$0xf0]  ;;  %v2664_v15 = vld [vmem:[%s5317_s1 + $0x60] sm:$0xf0]  ;;  %v3506_v25 = vld [vmem:[%s5317_s1 + $0xa4] sm:$0xf0]  ;;  %286 = vmatpush.bf16.msra.mxu2 %v2735_v22 }
   0x7   :  { %v2630_v17 = vld [vmem:[%s5317_s1] sm:$0xf]  ;;  %v2663_v21 = vor.u32 %v3497_v13, %v2662_v12  ;;  %v3502_v26 = vld [vmem:[%s5317_s1 + $0x8c] sm:$0xf]  ;;  %v2667_v27 = vor.u32 %v3493_v14, %v2664_v15  ;;  %v3485_v29 = vld [vmem:[%s5317_s1 + $0x4] sm:$0xf]  ;;  %299 = vmatpush.bf16.msra.mxu3 %v2739_v23  ;;  %v2703_v33 = vor.u32 %v3506_v25, %v2702_v24 }
   0x8   :  { %v3489_v28 = vld [vmem:[%s5317_s1 + $0x1c] sm:$0xf0]  ;;  %v2704_v30 = vld [vmem:[%s5317_s1 + $0xa8] sm:$0xf0]  ;;  %v2632_v31 = vld [vmem:[%s5317_s1 + $0x20] sm:$0xf0] }
   0x9   :  { %261 = vmatpush.bf16.msra.mxu0 %v2695_v10  ;;  %274 = vmatpush.bf16.msra.mxu1 %v2699_v11  ;;  %v40_v32 = vld [vmem:[%s5316_s0] sm:$0xff]  ;;  %v2707_v34 = vor.u32 %v3502_v26, %v2704_v30  ;;  %v2670_v35 = vld [vmem:[%s5317_s1 + $0x48] sm:$0xf]  ;;  %v3494_v37 = vld [vmem:[%s5317_s1 + $0x4c] sm:$0xf]  ;;  %v2631_v39 = vor.u32 %v3489_v28, %v2630_v17  ;;  %v2635_v43 = vor.u32 %v3485_v29, %v2632_v31 }
   0xa   :  { %v3498_v36 = vld [vmem:[%s5317_s1 + $0x64] sm:$0xf0]  ;;  %v2672_v38 = vld [vmem:[%s5317_s1 + $0x68] sm:$0xf0]  ;;  %v2742_v40 = vld [vmem:[%s5317_s1 + $0xd0] sm:$0xf]  ;;  %287 = vmatpush.bf16.msra.mxu2 %v2703_v33  ;;  %v3898_v52 = vpack.c.bf16 %v40_v32, %v40_v32 }
   0xb   :  { %v3515_v41 = vld [vmem:[%s5317_s1 + $0xec] sm:$0xf0]  ;;  %v3511_v42 = vld [vmem:[%s5317_s1 + $0xd4] sm:$0xf]  ;;  %v2638_v44 = vld [vmem:[%s5317_s1 + $0x8] sm:$0xf]  ;;  %300 = vmatpush.bf16.msra.mxu3 %v2707_v34  ;;  %v2671_v47 = vor.u32 %v3498_v36, %v2670_v35  ;;  %v2675_v48 = vor.u32 %v3494_v37, %v2672_v38 }
   0xc   :  { %v2743_v45 = vor.u32 %v3515_v41, %v2742_v40  ;;  %v2744_v46 = vld [vmem:[%s5317_s1 + $0xf0] sm:$0xf0]  ;;  %v3490_v49 = vld [vmem:[%s5317_s1 + $0x24] sm:$0xf0]  ;;  %v2710_v50 = vld [vmem:[%s5317_s1 + $0x90] sm:$0xf] }
   0xd   :  { %262 = vmatpush.bf16.msra.mxu0 %v2663_v21  ;;  %275 = vmatpush.bf16.msra.mxu1 %v2667_v27  ;;  %v3507_v51 = vld [vmem:[%s5317_s1 + $0xac] sm:$0xf0]  ;;  %v3486_v53 = vld [vmem:[%s5317_s1 + $0xc] sm:$0xf]  ;;  %v2747_v55 = vor.u32 %v3511_v42, %v2744_v46  ;;  %v3503_v56 = vld [vmem:[%s5317_s1 + $0x94] sm:$0xf]  ;;  %v2639_v63 = vor.u32 %v3490_v49, %v2638_v44 }
   0xe   :  { %v2640_v54 = vld [vmem:[%s5317_s1 + $0x28] sm:$0xf0]  ;;  %v2712_v57 = vld [vmem:[%s5317_s1 + $0xb0] sm:$0xf0]  ;;  %v2750_v58 = vld [vmem:[%s5317_s1 + $0xd8] sm:$0xf]  ;;  %v2711_v60 = vor.u32 %v3507_v51, %v2710_v50  ;;  %288 = vmatpush.bf16.msra.mxu2 %v2671_v47 }
   0xf   :  { %v3516_v59 = vld [vmem:[%s5317_s1 + $0xf4] sm:$0xf0]  ;;  %v3512_v61 = vld [vmem:[%s5317_s1 + $0xdc] sm:$0xf]  ;;  %301 = vmatpush.bf16.msra.mxu3 %v2675_v48  ;;  %v2643_v0 = vor.u32 %v3486_v53, %v2640_v54  ;;  %v2715_v1 = vor.u32 %v3503_v56, %v2712_v57  ;;  %v2678_v2 = vld [vmem:[%s5317_s1 + $0x50] sm:$0xf] }
  0x10   :  { %v2752_v62 = vld [vmem:[%s5317_s1 + $0xf8] sm:$0xf0]  ;;  %v3499_v3 = vld [vmem:[%s5317_s1 + $0x6c] sm:$0xf0]  ;;  %v3495_v4 = vld [vmem:[%s5317_s1 + $0x54] sm:$0xf]  ;;  %v2751_v5 = vor.u32 %v3516_v59, %v2750_v58 }
  0x11   :  { %263 = vmatpush.bf16.msra.mxu0 %v2631_v39  ;;  %276 = vmatpush.bf16.msra.mxu1 %v2635_v43  ;;  %v2680_v6 = vld [vmem:[%s5317_s1 + $0x70] sm:$0xf0]  ;;  %v2755_v7 = vor.u32 %v3512_v61, %v2752_v62  ;;  %v2718_v8 = vld [vmem:[%s5317_s1 + $0x98] sm:$0xf]  ;;  %v3504_v10 = vld [vmem:[%s5317_s1 + $0x9c] sm:$0xf]  ;;  %v2679_v12 = vor.u32 %v3499_v3, %v2678_v2 }
  0x12   :  { %v3508_v9 = vld [vmem:[%s5317_s1 + $0xb4] sm:$0xf0]  ;;  %v2720_v11 = vld [vmem:[%s5317_s1 + $0xb8] sm:$0xf0]  ;;  %289 = vmatpush.bf16.msra.mxu2 %v2639_v63  ;;  %v2646_v13 = vld [vmem:[%s5317_s1 + $0x10] sm:$0xf]  ;;  %v2683_v14 = vor.u32 %v3495_v4, %v2680_v6 }
  0x13   :  { %302 = vmatpush.bf16.msra.mxu3 %v2643_v0  ;;  %v3491_v15 = vld [vmem:[%s5317_s1 + $0x2c] sm:$0xf0]  ;;  %v3487_v16 = vld [vmem:[%s5317_s1 + $0x14] sm:$0xf]  ;;  %v2719_v18 = vor.u32 %v3508_v9, %v2718_v8  ;;  %v2723_v19 = vor.u32 %v3504_v10, %v2720_v11  ;;  %v3564_v21 = vld [vmem:[%s5321_s5 + $0x74] sm:$0xf0] }
  0x14   :  { %2756 = vmatmul.msk.bf16.vlgmr.msra.gmra.mxu0 %vm252_vm0, %v3898_v52  ;;  %2757 = vmatmul.msk.bf16.vlgmr.msra.gmra.mxu1 %vm252_vm0, %v3898_v52  ;;  %v2648_v17 = vld [vmem:[%s5317_s1 + $0x30] sm:$0xf0]  ;;  %v2822_v20 = vld [vmem:[%s5321_s5 + $0x70] sm:$0xf]  ;;  %v2824_v23 = vld [vmem:[%s5321_s5 + $0x78] sm:$0xf0]  ;;  %v2647_v26 = vor.u32 %v3491_v15, %v2646_v13 }
  0x15   :  { %312 = vmatpush.bf16.msrb.mxu0 %v2743_v45  ;;  %325 = vmatpush.bf16.msrb.mxu1 %v2747_v55  ;;  %v3563_v22 = vld [vmem:[%s5321_s5 + $0x74] sm:$0xf]  ;;  %v2686_v24 = vld [vmem:[%s5317_s1 + $0x58] sm:$0xf]  ;;  %v3496_v27 = vld [vmem:[%s5317_s1 + $0x5c] sm:$0xf]  ;;  %v2651_v29 = vor.u32 %v3487_v16, %v2648_v17  ;;  %v3992_v30 = vor.u32 %v3564_v21, %v2822_v20 }
  0x16   :  { %338 = vmatpush.bf16.msrb.mxu2 %v2751_v5  ;;  %2759 = vmatmul.msk.bf16.vlgmr.msra.gmra.mxu3 %vm252_vm0, %v3898_v52  ;;  %v3500_v25 = vld [vmem:[%s5317_s1 + $0x74] sm:$0xf0]  ;;  %v2688_v28 = vld [vmem:[%s5317_s1 + $0x78] sm:$0xf0]  ;;  %v2814_v31 = vld [vmem:[%s5321_s5 + $0x60] sm:$0xf]  ;;  %v3997_v32 = vor.u32 %v3563_v22, %v2824_v23 }
  0x17   :  { %351 = vmatpush.bf16.msrb.mxu3 %v2755_v7  ;;  %2758 = vmatmul.msk.bf16.vlgmr.msra.gmra.mxu2 %vm252_vm0, %v3898_v52  ;;  %v2687_v33 = vor.u32 %v3500_v25, %v2686_v24  ;;  %v3562_v34 = vld [vmem:[%s5321_s5 + $0x64] sm:$0xf0]  ;;  %v3561_v35 = vld [vmem:[%s5321_s5 + $0x64] sm:$0xf]  ;;  %v2816_v36 = vld [vmem:[%s5321_s5 + $0x68] sm:$0xf0]  ;;  %v2691_v37 = vor.u32 %v3496_v27, %v2688_v28 }
  0x18   :  { %v2654_v38 = vld [vmem:[%s5317_s1 + $0x18] sm:$0xf]  ;;  %v3488_v40 = vld [vmem:[%s5317_s1 + $0x1c] sm:$0xf]  ;;  %v2886_v42 = vld [vmem:[%s5320_s4 + $0x70] sm:$0xf]  ;;  %v4027_v44 = vor.u32 %v3562_v34, %v2814_v31  ;;  %v4036_v47 = vor.u32 %v3561_v35, %v2816_v36 }
  0x19   :  { %313 = vmatpush.bf16.msrb.mxu0 %v2711_v60  ;;  %326 = vmatpush.bf16.msrb.mxu1 %v2715_v1  ;;  %v3492_v39 = vld [vmem:[%s5317_s1 + $0x34] sm:$0xf0]  ;;  %v2656_v41 = vld [vmem:[%s5317_s1 + $0x38] sm:$0xf0]  ;;  %v3547_v45 = vld [vmem:[%s5320_s4 + $0x74] sm:$0xf] }
  0x1a   :  { %339 = vmatpush.bf16.msrb.mxu2 %v2719_v18  ;;  %v3548_v43 = vld [vmem:[%s5320_s4 + $0x74] sm:$0xf0]  ;;  %v2888_v46 = vld [vmem:[%s5320_s4 + $0x78] sm:$0xf0]  ;;  %v2655_v48 = vor.u32 %v3492_v39, %v2654_v38  ;;  %v2806_v49 = vld [vmem:[%s5321_s5 + $0x50] sm:$0xf]  ;;  %v2659_v51 = vor.u32 %v3488_v40, %v2656_v41 }
  0x1b   :  { %352 = vmatpush.bf16.msrb.mxu3 %v2723_v19  ;;  %v3560_v50 = vld [vmem:[%s5321_s5 + $0x54] sm:$0xf0]  ;;  %v3559_v53 = vld [vmem:[%s5321_s5 + $0x54] sm:$0xf]  ;;  %v2808_v54 = vld [vmem:[%s5321_s5 + $0x58] sm:$0xf0]  ;;  %v4050_v55 = vor.u32 %v3548_v43, %v2886_v42  ;;  %v4052_v56 = vor.u32 %v3547_v45, %v2888_v46 }
  0x1c   :  { %v2878_v57 = vld [vmem:[%s5320_s4 + $0x60] sm:$0xf]  ;;  %v3546_v58 = vld [vmem:[%s5320_s4 + $0x64] sm:$0xf0]  ;;  %v4061_v59 = vor.u32 %v3560_v50, %v2806_v49  ;;  %v3545_v60 = vld [vmem:[%s5320_s4 + $0x64] sm:$0xf]  ;;  %v4070_v62 = vor.u32 %v3559_v53, %v2808_v54 }
  0x1d   :  { %314 = vmatpush.bf16.msrb.mxu0 %v2679_v12  ;;  %327 = vmatpush.bf16.msrb.mxu1 %v2683_v14  ;;  %v2880_v61 = vld [vmem:[%s5320_s4 + $0x68] sm:$0xf0]  ;;  %v2798_v63 = vld [vmem:[%s5321_s5 + $0x40] sm:$0xf]  ;;  %v3558_v0 = vld [vmem:[%s5321_s5 + $0x44] sm:$0xf0]  ;;  %v4085_v3 = vor.u32 %v3546_v58, %v2878_v57 }
  0x1e   :  { %340 = vmatpush.bf16.msrb.mxu2 %v2687_v33  ;;  %v3557_v1 = vld [vmem:[%s5321_s5 + $0x44] sm:$0xf]  ;;  %v2800_v2 = vld [vmem:[%s5321_s5 + $0x48] sm:$0xf0]  ;;  %v4088_v4 = vor.u32 %v3545_v60, %v2880_v61  ;;  %v2870_v5 = vld [vmem:[%s5320_s4 + $0x50] sm:$0xf]  ;;  %v4099_v7 = vor.u32 %v3558_v0, %v2798_v63 }
  0x1f   :  { %353 = vmatpush.bf16.msrb.mxu3 %v2691_v37  ;;  %v3544_v6 = vld [vmem:[%s5320_s4 + $0x54] sm:$0xf0]  ;;  %v3543_v8 = vld [vmem:[%s5320_s4 + $0x54] sm:$0xf]  ;;  %v2872_v9 = vld [vmem:[%s5320_s4 + $0x58] sm:$0xf0]  ;;  %v4110_v10 = vor.u32 %v3557_v1, %v2800_v2 }
  0x20   :  { %5346 = vst [vmem:[#allocation5_spill] sm:$0xff] %v4099_v7  ;;  %v2790_v11 = vld [vmem:[%s5321_s5 + $0x30] sm:$0xf]  ;;  %v3556_v12 = vld [vmem:[%s5321_s5 + $0x34] sm:$0xf0]  ;;  %v4125_v15 = vor.u32 %v3544_v6, %v2870_v5  ;;  %v4130_v16 = vor.u32 %v3543_v8, %v2872_v9 }
  0x21   :  { %315 = vmatpush.bf16.msrb.mxu0 %v2647_v26  ;;  %328 = vmatpush.bf16.msrb.mxu1 %v2651_v29  ;;  %5347 = vst [vmem:[#allocation6_spill] sm:$0xff] %v4110_v10  ;;  %v3555_v13 = vld [vmem:[%s5321_s5 + $0x34] sm:$0xf]  ;;  %v2792_v14 = vld [vmem:[%s5321_s5 + $0x38] sm:$0xf0]  ;;  %v4141_v19 = vor.u32 %v3556_v12, %v2790_v11 }
  0x22   :  { %341 = vmatpush.bf16.msrb.mxu2 %v2655_v48  ;;  %v2862_v17 = vld [vmem:[%s5320_s4 + $0x40] sm:$0xf]  ;;  %v3542_v18 = vld [vmem:[%s5320_s4 + $0x44] sm:$0xf0]  ;;  %v3541_v20 = vld [vmem:[%s5320_s4 + $0x44] sm:$0xf]  ;;  %v4150_v22 = vor.u32 %v3555_v13, %v2792_v14 }
  0x23   :  { %354 = vmatpush.bf16.msrb.mxu3 %v2659_v51  ;;  %5348 = vst [vmem:[#allocation7_spill] sm:$0xff] %v4141_v19  ;;  %v2864_v21 = vld [vmem:[%s5320_s4 + $0x48] sm:$0xf0]  ;;  %v3554_v23 = vld [vmem:[%s5321_s5 + $0x24] sm:$0xf0]  ;;  %v4165_v26 = vor.u32 %v3542_v18, %v2862_v17 }
  0x24   :  { %2760 = vmatmul.msk.bf16.vlgmr.msrb.gmra.mxu0 %vm252_vm0, %v3898_v52  ;;  %2761 = vmatmul.msk.bf16.vlgmr.msrb.gmra.mxu1 %vm252_vm0, %v3898_v52  ;;  %v3553_v24 = vld [vmem:[%s5321_s5 + $0x24] sm:$0xf]  ;;  %v2784_v25 = vld [vmem:[%s5321_s5 + $0x28] sm:$0xf0]  ;;  %v4168_v27 = vor.u32 %v3541_v20, %v2864_v21  ;;  %v2854_v28 = vld [vmem:[%s5320_s4 + $0x30] sm:$0xf] }
  0x25   :  { %504 = vmatpush.bf16.msra.mxu0 %v3992_v30  ;;  %517 = vmatpush.bf16.msra.mxu1 %v3997_v32  ;;  %v3540_v29 = vld [vmem:[%s5320_s4 + $0x34] sm:$0xf0]  ;;  %v3539_v33 = vld [vmem:[%s5320_s4 + $0x34] sm:$0xf]  ;;  %v2856_v34 = vld [vmem:[%s5320_s4 + $0x38] sm:$0xf0]  ;;  %v4186_v35 = vor.u32 %v3553_v24, %v2784_v25 }
  0x26   :  { %610 = vmatpush.bf16.msra.mxu2 %v4050_v55  ;;  %2763 = vmatmul.msk.bf16.vlgmr.msrb.gmra.mxu3 %vm252_vm0, %v3898_v52  ;;  %v2774_v36 = vld [vmem:[%s5321_s5 + $0x10] sm:$0xf]  ;;  %v3552_v37 = vld [vmem:[%s5321_s5 + $0x14] sm:$0xf0]  ;;  %v3551_v38 = vld [vmem:[%s5321_s5 + $0x14] sm:$0xf]  ;;  %v4201_v40 = vor.u32 %v3540_v29, %v2854_v28  ;;  %v4204_v41 = vor.u32 %v3539_v33, %v2856_v34 }
  0x27   :  { %623 = vmatpush.bf16.msra.mxu3 %v4052_v56  ;;  %2762 = vmatmul.msk.bf16.vlgmr.msrb.gmra.mxu2 %vm252_vm0, %v3898_v52  ;;  %v2782_v52 = vld [vmem:[%s5321_s5 + $0x20] sm:$0xf]  ;;  %v2776_v39 = vld [vmem:[%s5321_s5 + $0x18] sm:$0xf0]  ;;  %v3550_v43 = vld [vmem:[%s5321_s5 + $0x4] sm:$0xf0]  ;;  %v4222_v49 = vor.u32 %v3552_v37, %v2774_v36 }
  0x28   :  { %v4177_v31 = vor.u32 %v3554_v23, %v2782_v52  ;;  %v2766_v42 = vld [vmem:[%s5321_s5] sm:$0xf]  ;;  %v3538_v46 = vld [vmem:[%s5320_s4 + $0x24] sm:$0xf0]  ;;  %v3537_v48 = vld [vmem:[%s5320_s4 + $0x24] sm:$0xf]  ;;  %v4228_v51 = vor.u32 %v3551_v38, %v2776_v39 }
  0x29   :  { %505 = vmatpush.bf16.msra.mxu0 %v4027_v44  ;;  %518 = vmatpush.bf16.msra.mxu1 %v4036_v47  ;;  %v2846_v45 = vld [vmem:[%s5320_s4 + $0x20] sm:$0xf]  ;;  %v2848_v50 = vld [vmem:[%s5320_s4 + $0x28] sm:$0xf0]  ;;  %v3549_v53 = vld [vmem:[%s5321_s5 + $0x4] sm:$0xf] }
  0x2a   :  { %611 = vmatpush.bf16.msra.mxu2 %v4085_v3  ;;  %v2768_v54 = vld [vmem:[%s5321_s5 + $0x8] sm:$0xf0] }
  0x2b   :  { %624 = vmatpush.bf16.msra.mxu3 %v4088_v4 }
  0x2d   :  { %506 = vmatpush.bf16.msra.mxu0 %v4061_v59  ;;  %519 = vmatpush.bf16.msra.mxu1 %v4070_v62 }
  0x2e   :  { %612 = vmatpush.bf16.msra.mxu2 %v4125_v15 }
  0x2f   :  { %625 = vmatpush.bf16.msra.mxu3 %v4130_v16 }
  0x31   :  { %507 = vmatpush.bf16.msra.mxu0 %v4099_v7  ;;  %520 = vmatpush.bf16.msra.mxu1 %v4110_v10 }
  0x32   :  { %613 = vmatpush.bf16.msra.mxu2 %v4165_v26 }
  0x33   :  { %626 = vmatpush.bf16.msra.mxu3 %v4168_v27 }
  0x35   :  { %508 = vmatpush.bf16.msra.mxu0 %v4141_v19  ;;  %521 = vmatpush.bf16.msra.mxu1 %v4150_v22 }
  0x39   :  { %509 = vmatpush.bf16.msra.mxu0 %v4177_v31  ;;  %522 = vmatpush.bf16.msra.mxu1 %v4186_v35 }
  0x3a   :  { %16 = vsyncpa [#allocation3], 0  ;;  %614 = vmatpush.bf16.msra.mxu2 %v4201_v40  ;;  %v4237_v57 = vor.u32 %v3538_v46, %v2846_v45  ;;  %v2950_v58 = vld [vmem:[%s5319_s3 + $0x70] sm:$0xf]  ;;  %v3532_v60 = vld [vmem:[%s5319_s3 + $0x74] sm:$0xf0]  ;;  %627 = vmatpush.bf16.msra.mxu3 %v4204_v41  ;;  %v4249_v63 = vor.u32 %v3537_v48, %v2848_v50  ;;  %v4261_v5 = vor.u32 %v3550_v43, %v2766_v42 }
  0x3b   :  { %v3531_v61 = vld [vmem:[%s5319_s3 + $0x74] sm:$0xf]  ;;  %v2952_v0 = vld [vmem:[%s5319_s3 + $0x78] sm:$0xf0]  ;;  %v2838_v1 = vld [vmem:[%s5320_s4 + $0x10] sm:$0xf]  ;;  %v4270_v9 = vor.u32 %v3549_v53, %v2768_v54  ;;  %v4272_v11 = vor.u32 %v3532_v60, %v2950_v58 }
  0x3c   :  { %v3536_v2 = vld [vmem:[%s5320_s4 + $0x14] sm:$0xf0]  ;;  %v3535_v6 = vld [vmem:[%s5320_s4 + $0x14] sm:$0xf]  ;;  %v2840_v8 = vld [vmem:[%s5320_s4 + $0x18] sm:$0xf0]  ;;  %v4275_v12 = vor.u32 %v3531_v61, %v2952_v0 }
  0x3d   :  { %510 = vmatpush.bf16.msra.mxu0 %v4222_v49  ;;  %523 = vmatpush.bf16.msra.mxu1 %v4228_v51  ;;  %v4277_v13 = vor.u32 %v3536_v2, %v2838_v1  ;;  %v2942_v14 = vld [vmem:[%s5319_s3 + $0x60] sm:$0xf]  ;;  %v3530_v17 = vld [vmem:[%s5319_s3 + $0x64] sm:$0xf0]  ;;  %v3529_v18 = vld [vmem:[%s5319_s3 + $0x64] sm:$0xf]  ;;  %v4289_v20 = vor.u32 %v3535_v6, %v2840_v8 }
  0x3e   :  { %615 = vmatpush.bf16.msra.mxu2 %v4237_v57  ;;  %628 = vmatpush.bf16.msra.mxu3 %v4249_v63  ;;  %v2944_v21 = vld [vmem:[%s5319_s3 + $0x68] sm:$0xf0]  ;;  %v2830_v52 = vld [vmem:[%s5320_s4] sm:$0xf]  ;;  %v3534_v23 = vld [vmem:[%s5320_s4 + $0x4] sm:$0xf0]  ;;  %v4309_v28 = vor.u32 %v3530_v17, %v2942_v14 }
  0x3f   :  { %5349 = vst [vmem:[#allocation8_spill] sm:$0xff] %v4277_v13  ;;  %v3533_v24 = vld [vmem:[%s5320_s4 + $0x4] sm:$0xf]  ;;  %v2832_v25 = vld [vmem:[%s5320_s4 + $0x8] sm:$0xf0]  ;;  %v4313_v29 = vor.u32 %v3529_v18, %v2944_v21  ;;  %v4315_v33 = vor.u32 %v3534_v23, %v2830_v52  ;;  %s2619_s19 = sshll.u32 %s5327_s11, 4  ;;  %s2620_s19 = int_to_ptr.hbm [resolvable:$true] %s2619_s19 }
  0x40   :  { %5350 = vst [vmem:[#allocation9_spill] sm:$0xff] %v4289_v20  ;;  %v2934_v34 = vld [vmem:[%s5319_s3 + $0x50] sm:$0xf]  ;;  %v3528_v36 = vld [vmem:[%s5319_s3 + $0x54] sm:$0xf0]  ;;  %v4324_v37 = vor.u32 %v3533_v24, %v2832_v25 }
  0x41   :  { %511 = vmatpush.bf16.msra.mxu0 %v4261_v5  ;;  %524 = vmatpush.bf16.msra.mxu1 %v4270_v9  ;;  %5351 = vst [vmem:[#allocation10_spill] sm:$0xff] %v4315_v33  ;;  %v3527_v38 = vld [vmem:[%s5319_s3 + $0x54] sm:$0xf]  ;;  %v2936_v39 = vld [vmem:[%s5319_s3 + $0x58] sm:$0xf0]  ;;  %v4333_v42 = vor.u32 %v3528_v36, %v2934_v34 }
  0x42   :  { %616 = vmatpush.bf16.msra.mxu2 %v4277_v13  ;;  %629 = vmatpush.bf16.msra.mxu3 %v4289_v20  ;;  %5352 = vst [vmem:[#allocation11_spill] sm:$0xff] %v4324_v37  ;;  %v4337_v43 = vor.u32 %v3527_v38, %v2936_v39  ;;  %v2926_v45 = vld [vmem:[%s5319_s3 + $0x40] sm:$0xf]  ;;  %v3526_v46 = vld [vmem:[%s5319_s3 + $0x44] sm:$0xf0] }
  0x43   :  { %v3525_v48 = vld [vmem:[%s5319_s3 + $0x44] sm:$0xf]  ;;  %v2928_v50 = vld [vmem:[%s5319_s3 + $0x48] sm:$0xf0]  ;;  %v4355_v53 = vor.u32 %v3526_v46, %v2926_v45  ;;  %v2918_v58 = vld [vmem:[%s5319_s3 + $0x30] sm:$0xf] }
  0x44   :  { %v4358_v54 = vor.u32 %v3525_v48, %v2928_v50  ;;  %v3524_v60 = vld [vmem:[%s5319_s3 + $0x34] sm:$0xf0]  ;;  %v3523_v61 = vld [vmem:[%s5319_s3 + $0x34] sm:$0xf]  ;;  %v2920_v0 = vld [vmem:[%s5319_s3 + $0x38] sm:$0xf0] }
  0x45   :  { %760 = vmatpush.bf16.msrb.mxu0 %v4272_v11  ;;  %773 = vmatpush.bf16.msrb.mxu1 %v4275_v12  ;;  %v4375_v1 = vor.u32 %v3524_v60, %v2918_v58  ;;  %v4378_v2 = vor.u32 %v3523_v61, %v2920_v0  ;;  %v2910_v6 = vld [vmem:[%s5319_s3 + $0x20] sm:$0xf]  ;;  %v3522_v8 = vld [vmem:[%s5319_s3 + $0x24] sm:$0xf0]  ;;  %v3521_v14 = vld [vmem:[%s5319_s3 + $0x24] sm:$0xf] }
  0x46   :  { %617 = vmatpush.bf16.msra.mxu2 %v4315_v33  ;;  %630 = vmatpush.bf16.msra.mxu3 %v4324_v37  ;;  %v4403_v17 = vor.u32 %v3522_v8, %v2910_v6  ;;  %v2912_v18 = vld [vmem:[%s5319_s3 + $0x28] sm:$0xf0]  ;;  %v2902_v52 = vld [vmem:[%s5319_s3 + $0x10] sm:$0xf]  ;;  %v3520_v23 = vld [vmem:[%s5319_s3 + $0x14] sm:$0xf0] }
  0x47   :  { %v4408_v21 = vor.u32 %v3521_v14, %v2912_v18  ;;  %v3519_v24 = vld [vmem:[%s5319_s3 + $0x14] sm:$0xf]  ;;  %v4421_v25 = vor.u32 %v3520_v23, %v2902_v52  ;;  %v2904_v34 = vld [vmem:[%s5319_s3 + $0x18] sm:$0xf0]  ;;  %v2894_v38 = vld [vmem:[%s5319_s3] sm:$0xf] }
  0x48   :  { %v4426_v36 = vor.u32 %v3519_v24, %v2904_v34  ;;  %v3518_v39 = vld [vmem:[%s5319_s3 + $0x4] sm:$0xf0]  ;;  %v3517_v45 = vld [vmem:[%s5319_s3 + $0x4] sm:$0xf]  ;;  %v2896_v48 = vld [vmem:[%s5319_s3 + $0x8] sm:$0xf0] }
  0x49   :  { %761 = vmatpush.bf16.msrb.mxu0 %v4309_v28  ;;  %774 = vmatpush.bf16.msrb.mxu1 %v4313_v29  ;;  %v4439_v46 = vor.u32 %v3518_v39, %v2894_v38  ;;  %v4444_v50 = vor.u32 %v3517_v45, %v2896_v48  ;;  %v4451_v58 = vld [vmem:[%s5318_s2] sm:$0xff] }
  0x4a   :  { %786 = vmatpush.bf16.msrb.mxu2 %v4050_v55  ;;  %799 = vmatpush.bf16.msrb.mxu3 %v4052_v56  ;;  %v76_v60 = vperm.slane %v4451_v58, 0  ;;  %v77_v61 = vperm.slane %v4451_v58, 1 }
  0x4d   :  { %762 = vmatpush.bf16.msrb.mxu0 %v4333_v42  ;;  %775 = vmatpush.bf16.msrb.mxu1 %v4337_v43 }
  0x4e   :  { %787 = vmatpush.bf16.msrb.mxu2 %v4085_v3  ;;  %800 = vmatpush.bf16.msrb.mxu3 %v4088_v4 }
  0x51   :  { %763 = vmatpush.bf16.msrb.mxu0 %v4355_v53  ;;  %776 = vmatpush.bf16.msrb.mxu1 %v4358_v54 }
  0x52   :  { %788 = vmatpush.bf16.msrb.mxu2 %v4125_v15  ;;  %801 = vmatpush.bf16.msrb.mxu3 %v4130_v16 }
  0x55   :  { %764 = vmatpush.bf16.msrb.mxu0 %v4375_v1  ;;  %777 = vmatpush.bf16.msrb.mxu1 %v4378_v2 }
  0x56   :  { %789 = vmatpush.bf16.msrb.mxu2 %v4165_v26  ;;  %802 = vmatpush.bf16.msrb.mxu3 %v4168_v27 }
  0x59   :  { %765 = vmatpush.bf16.msrb.mxu0 %v4403_v17  ;;  %778 = vmatpush.bf16.msrb.mxu1 %v4408_v21 }
  0x5a   :  { %790 = vmatpush.bf16.msrb.mxu2 %v4201_v40  ;;  %803 = vmatpush.bf16.msrb.mxu3 %v4204_v41 }
  0x5d   :  { %766 = vmatpush.bf16.msrb.mxu0 %v4421_v25  ;;  %779 = vmatpush.bf16.msrb.mxu1 %v4426_v36 }
  0x5e   :  { %791 = vmatpush.bf16.msrb.mxu2 %v4237_v57  ;;  %804 = vmatpush.bf16.msrb.mxu3 %v4249_v63 }
  0x61   :  { %767 = vmatpush.bf16.msrb.mxu0 %v4439_v46  ;;  %780 = vmatpush.bf16.msrb.mxu1 %v4444_v50 }
  0x62   :  { %792 = vmatpush.bf16.msrb.mxu2 %v4277_v13  ;;  %805 = vmatpush.bf16.msrb.mxu3 %v4289_v20 }
  0x66   :  { %793 = vmatpush.bf16.msrb.mxu2 %v4315_v33  ;;  %806 = vmatpush.bf16.msrb.mxu3 %v4324_v37 }
  0x91   :  { %v265_v0 = vpop.f32.mrf.mxu0  ;;  %v278_v8 = vpop.f32.mrf.mxu1 }
  0x92   :  { %v266_v6 = vadd.f32 %v265_v0, %v76_v60  ;;  %v279_v14 = vadd.f32 %v278_v8, %v77_v61  ;;  %v80_v60 = vperm.slane %v4451_v58, 4  ;;  %v81_v61 = vperm.slane %v4451_v58, 5 }
  0x94   :  { %v360_v18 = vmax.f32 %v266_v6, 0.0  ;;  %v361_v52 = vmax.f32 %v279_v14, 0.0 }
  0x96   :  { %v368_v23 = vpack.c.bf16 %v361_v52, %v360_v18 }
  0x98   :  { %v421_v24 = vunpack.c.h.b16 %v368_v23  ;;  %618 = vmatmul.bf16.vlgmr.msra.gmra.mxu2 %v368_v23  ;;  %631 = vmatmul.bf16.vlgmr.msra.gmra.mxu3 %v368_v23 }
  0x99   :  { %v267_v34 = vpop.f32.mrf.mxu0  ;;  %v280_v38 = vpop.f32.mrf.mxu1 }
  0x9a   :  { %v4455_v39 = vpack.c.b16 %v421_v24, %v421_v24  ;;  %v291_v45 = vpop.f32.mrf.mxu2  ;;  %v304_v48 = vpop.f32.mrf.mxu3  ;;  %v3588_v34 = vld [vmem:[%s5323_s7 + $0xb8] sm:$0xff] }
  0x9b   :  { %v3596_v38 = vld [vmem:[%s5323_s7 + $0xf8] sm:$0xff]  ;;  %974 = vmatpush.bf16.msra.mxu2 %v3588_v34 }
  0x9c   :  { %5353 = vst [vmem:[#allocation12_spill] sm:$0xff] %v4455_v39  ;;  %512 = vmatmul.bf16.vlgmr.msra.gmra.mxu0 %v4455_v39  ;;  %525 = vmatmul.bf16.vlgmr.msra.gmra.mxu1 %v4455_v39 }
  0x9d   :  { %812 = vmatpush.bf16.msra.mxu0 %v3992_v30  ;;  %825 = vmatpush.bf16.msra.mxu1 %v3997_v32 }
  0x9e   :  { %987 = vmatpush.bf16.msra.mxu3 %v3596_v38 }
  0xa1   :  { %813 = vmatpush.bf16.msra.mxu0 %v4027_v44  ;;  %826 = vmatpush.bf16.msra.mxu1 %v4036_v47  ;;  %v317_v0 = vpop.f32.mrf.mxu0  ;;  %v330_v18 = vpop.f32.mrf.mxu1 }
  0xa2   :  { %v293_v6 = vpop.f32.mrf.mxu2  ;;  %v306_v8 = vpop.f32.mrf.mxu3  ;;  %v318_v14 = vadd.f32 %v317_v0, %v80_v60  ;;  %v331_v24 = vadd.f32 %v330_v18, %v81_v61  ;;  %v82_v61 = vperm.slane %v4451_v58, 6 }
  0xa3   :  { %v83_v6 = vperm.slane %v4451_v58, 7  ;;  %v3587_v8 = vld [vmem:[%s5323_s7 + $0xb0] sm:$0xff] }
  0xa4   :  { %v364_v52 = vmax.f32 %v318_v14, 0.0  ;;  %v365_v60 = vmax.f32 %v331_v24, 0.0  ;;  %v3595_v14 = vld [vmem:[%s5323_s7 + $0xf0] sm:$0xff]  ;;  %v79_v24 = vperm.slane %v4451_v58, 3  ;;  %975 = vmatpush.bf16.msra.mxu2 %v3587_v8  ;;  %v3593_v8 = vld [vmem:[%s5323_s7 + $0xe0] sm:$0xff] }
  0xa5   :  { %814 = vmatpush.bf16.msra.mxu0 %v4061_v59  ;;  %827 = vmatpush.bf16.msra.mxu1 %v4070_v62 }
  0xa6   :  { %v4477_v0 = vpack.c.bf16 %v365_v60, %v364_v52  ;;  %v78_v52 = vperm.slane %v4451_v58, 2  ;;  %988 = vmatpush.bf16.msra.mxu3 %v3595_v14  ;;  %v3580_v14 = vld [vmem:[%s5323_s7 + $0x78] sm:$0xff] }
  0xa8   :  { %794 = vmatmul.bf16.vlgmr.msrb.gmra.mxu2 %v4455_v39  ;;  %807 = vmatmul.bf16.vlgmr.msrb.gmra.mxu3 %v4455_v39  ;;  %5354 = vst [vmem:[#allocation13_spill] sm:$0xff] %v4477_v0 }
  0xa9   :  { %815 = vmatpush.bf16.msra.mxu0 %v4099_v7  ;;  %828 = vmatpush.bf16.msra.mxu1 %v4110_v10  ;;  %v319_v18 = vpop.f32.mrf.mxu0  ;;  %v332_v38 = vpop.f32.mrf.mxu1  ;;  %v292_v10 = vadd.f32 %v291_v45, %v78_v52  ;;  %v305_v7 = vadd.f32 %v304_v48, %v79_v24  ;;  %v3571_v24 = vld [vmem:[%s5323_s7 + $0x30] sm:$0xff] }
  0xaa   :  { %v356_v34 = vpop.f32.mrf.mxu3  ;;  %v343_v60 = vpop.f32.mrf.mxu2  ;;  %v3586_v18 = vld [vmem:[%s5323_s7 + $0xa8] sm:$0xff] }
  0xab   :  { %v357_v0 = vadd.f32 %v356_v34, %v83_v6  ;;  %v344_v39 = vadd.f32 %v343_v60, %v82_v61  ;;  %976 = vmatpush.bf16.msra.mxu2 %v3586_v18  ;;  %v3585_v61 = vld [vmem:[%s5323_s7 + $0xa0] sm:$0xff]  ;;  %v363_v45 = vmax.f32 %v305_v7, 0.0  ;;  %v3584_v7 = vld [vmem:[%s5323_s7 + $0x98] sm:$0xff]  ;;  %v3579_v34 = vld [vmem:[%s5323_s7 + $0x70] sm:$0xff] }
  0xac   :  { %768 = vmatmul.bf16.vlgmr.msrb.gmra.mxu0 %v368_v23  ;;  %781 = vmatmul.bf16.vlgmr.msrb.gmra.mxu1 %v368_v23  ;;  %v3594_v23 = vld [vmem:[%s5323_s7 + $0xe8] sm:$0xff]  ;;  %v3569_v18 = vld [vmem:[%s5323_s7 + $0x20] sm:$0xff] }
  0xad   :  { %816 = vmatpush.bf16.msra.mxu0 %v4141_v19  ;;  %829 = vmatpush.bf16.msra.mxu1 %v4150_v22  ;;  %v367_v58 = vmax.f32 %v357_v0, 0.0  ;;  %v366_v19 = vmax.f32 %v344_v39, 0.0  ;;  %v362_v0 = vmax.f32 %v292_v10, 0.0  ;;  %v3592_v10 = vld [vmem:[%s5323_s7 + $0xd8] sm:$0xff]  ;;  %v3570_v38 = vld [vmem:[%s5323_s7 + $0x28] sm:$0xff] }
  0xae   :  { %989 = vmatpush.bf16.msra.mxu3 %v3594_v23  ;;  %v3578_v60 = vld [vmem:[%s5323_s7 + $0x68] sm:$0xff]  ;;  %v3577_v23 = vld [vmem:[%s5323_s7 + $0x60] sm:$0xff] }
  0xaf   :  { %v4499_v6 = vpack.c.bf16 %v367_v58, %v366_v19  ;;  %v3572_v19 = vld [vmem:[%s5323_s7 + $0x38] sm:$0xff]  ;;  %977 = vmatpush.bf16.msra.mxu2 %v3585_v61  ;;  %v4521_v52 = vpack.c.bf16 %v363_v45, %v362_v0  ;;  %v3575_v0 = vld [vmem:[%s5323_s7 + $0x50] sm:$0xff]  ;;  %v3566_v45 = vld [vmem:[%s5323_s7 + $0x8] sm:$0xff] }
  0xb0   :  { %v3568_v58 = vld [vmem:[%s5323_s7 + $0x18] sm:$0xff] }
  0xb1   :  { %817 = vmatpush.bf16.msra.mxu0 %v4177_v31  ;;  %830 = vmatpush.bf16.msra.mxu1 %v4186_v35  ;;  %5355 = vst [vmem:[#allocation14_spill] sm:$0xff] %v4499_v6  ;;  %v3576_v61 = vld [vmem:[%s5323_s7 + $0x58] sm:$0xff] }
  0xb2   :  { %v358_v48 = vpop.f32.mrf.mxu3  ;;  %v345_v39 = vpop.f32.mrf.mxu2  ;;  %990 = vmatpush.bf16.msra.mxu3 %v3593_v8  ;;  %v3567_v8 = vld [vmem:[%s5323_s7 + $0x10] sm:$0xff] }
  0xb3   :  { %978 = vmatpush.bf16.msra.mxu2 %v3584_v7  ;;  %v3574_v48 = vld [vmem:[%s5323_s7 + $0x48] sm:$0xff]  ;;  %v3565_v39 = vld [vmem:[%s5323_s7] sm:$0xff]  ;;  %v3591_v7 = vld [vmem:[%s5323_s7 + $0xd0] sm:$0xff] }
  0xb5   :  { %818 = vmatpush.bf16.msra.mxu0 %v4222_v49  ;;  %831 = vmatpush.bf16.msra.mxu1 %v4228_v51 }
  0xb6   :  { %991 = vmatpush.bf16.msra.mxu3 %v3592_v10  ;;  %v3582_v10 = vld [vmem:[%s5323_s7 + $0x88] sm:$0xff] }
  0xb9   :  { %819 = vmatpush.bf16.msra.mxu0 %v4261_v5  ;;  %832 = vmatpush.bf16.msra.mxu1 %v4270_v9 }
  0xba   :  { %992 = vmatpush.bf16.msra.mxu3 %v3591_v7 }
  0xbc   :  { %820 = vmatmul.bf16.vlgmr.msra.gmra.mxu0 %v4521_v52  ;;  %833 = vmatmul.bf16.vlgmr.msra.gmra.mxu1 %v4521_v52 }
  0xbd   :  { %1096 = vmatpush.bf16.msrb.mxu0 %v3572_v19  ;;  %1109 = vmatpush.bf16.msrb.mxu1 %v3580_v14  ;;  %v3573_v19 = vld [vmem:[%s5323_s7 + $0x40] sm:$0xff]  ;;  %v3583_v14 = vld [vmem:[%s5323_s7 + $0x90] sm:$0xff] }
  0xbe   :  { %979 = vmatpush.bf16.msra.mxu2 %v3583_v14 }
  0xc1   :  { %1097 = vmatpush.bf16.msrb.mxu0 %v3571_v24  ;;  %1110 = vmatpush.bf16.msrb.mxu1 %v3579_v34  ;;  %v3590_v24 = vld [vmem:[%s5323_s7 + $0xc8] sm:$0xff]  ;;  %v3581_v34 = vld [vmem:[%s5323_s7 + $0x80] sm:$0xff] }
  0xc2   :  { %980 = vmatpush.bf16.msra.mxu2 %v3582_v10  ;;  %993 = vmatpush.bf16.msra.mxu3 %v3590_v24 }
  0xc5   :  { %1098 = vmatpush.bf16.msrb.mxu0 %v3570_v38  ;;  %1111 = vmatpush.bf16.msrb.mxu1 %v3578_v60  ;;  %v3589_v38 = vld [vmem:[%s5323_s7 + $0xc0] sm:$0xff] }
  0xc6   :  { %981 = vmatpush.bf16.msra.mxu2 %v3581_v34  ;;  %994 = vmatpush.bf16.msra.mxu3 %v3589_v38  ;;  %v636_v60 = vld [vmem:[%s5322_s6] sm:$0x3] }
  0xc9   :  { %1099 = vmatpush.bf16.msrb.mxu0 %v3569_v18  ;;  %1112 = vmatpush.bf16.msrb.mxu1 %v3577_v23 }
  0xca   :  { %1122 = vmatpush.bf16.msrb.mxu2 %v4272_v11  ;;  %1135 = vmatpush.bf16.msrb.mxu3 %v4275_v12 }
  0xcd   :  { %1100 = vmatpush.bf16.msrb.mxu0 %v3568_v58  ;;  %1113 = vmatpush.bf16.msrb.mxu1 %v3576_v61  ;;  %v4618_v58 = vperm.slane %v636_v60, 0  ;;  %v4620_v61 = vperm.slane %v636_v60, 1 }
  0xce   :  { %1123 = vmatpush.bf16.msrb.mxu2 %v4309_v28  ;;  %1136 = vmatpush.bf16.msrb.mxu3 %v4313_v29 }
  0xd1   :  { %1101 = vmatpush.bf16.msrb.mxu0 %v3567_v8  ;;  %1114 = vmatpush.bf16.msrb.mxu1 %v3575_v0 }
  0xd2   :  { %1124 = vmatpush.bf16.msrb.mxu2 %v4333_v42  ;;  %1137 = vmatpush.bf16.msrb.mxu3 %v4337_v43 }
  0xd5   :  { %1102 = vmatpush.bf16.msrb.mxu0 %v3566_v45  ;;  %1115 = vmatpush.bf16.msrb.mxu1 %v3574_v48 }
  0xd6   :  { %1125 = vmatpush.bf16.msrb.mxu2 %v4355_v53  ;;  %1138 = vmatpush.bf16.msrb.mxu3 %v4358_v54 }
  0xd9   :  { %1103 = vmatpush.bf16.msrb.mxu0 %v3565_v39  ;;  %1116 = vmatpush.bf16.msrb.mxu1 %v3573_v19 }
  0xda   :  { %1126 = vmatpush.bf16.msrb.mxu2 %v4375_v1  ;;  %1139 = vmatpush.bf16.msrb.mxu3 %v4378_v2 }
  0xdd   :  { %1148 = vmatpush.bf16.msra.mxu0 %v4050_v55  ;;  %1161 = vmatpush.bf16.msra.mxu1 %v4052_v56 }
  0xde   :  { %1127 = vmatpush.bf16.msrb.mxu2 %v4403_v17  ;;  %1140 = vmatpush.bf16.msrb.mxu3 %v4408_v21 }
  0xe1   :  { %1149 = vmatpush.bf16.msra.mxu0 %v4085_v3  ;;  %1162 = vmatpush.bf16.msra.mxu1 %v4088_v4 }
  0xe2   :  { %1128 = vmatpush.bf16.msrb.mxu2 %v4421_v25  ;;  %1141 = vmatpush.bf16.msrb.mxu3 %v4426_v36 }
  0xe5   :  { %1150 = vmatpush.bf16.msra.mxu0 %v4125_v15  ;;  %1163 = vmatpush.bf16.msra.mxu1 %v4130_v16 }
  0xe6   :  { %1129 = vmatpush.bf16.msrb.mxu2 %v4439_v46  ;;  %1142 = vmatpush.bf16.msrb.mxu3 %v4444_v50 }
  0xe9   :  { %1151 = vmatpush.bf16.msra.mxu0 %v4165_v26  ;;  %1164 = vmatpush.bf16.msra.mxu1 %v4168_v27 }
  0xed   :  { %1152 = vmatpush.bf16.msra.mxu0 %v4201_v40  ;;  %1165 = vmatpush.bf16.msra.mxu1 %v4204_v41 }
  0xf1   :  { %1153 = vmatpush.bf16.msra.mxu0 %v4237_v57  ;;  %1166 = vmatpush.bf16.msra.mxu1 %v4249_v63 }
  0xf5   :  { %1154 = vmatpush.bf16.msra.mxu0 %v4277_v13  ;;  %1167 = vmatpush.bf16.msra.mxu1 %v4289_v20 }
  0xf9   :  { %1155 = vmatpush.bf16.msra.mxu0 %v4315_v33  ;;  %1168 = vmatpush.bf16.msra.mxu1 %v4324_v37 }
 0x119   :  { %v513_v18 = vpop.f32.mrf.mxu0  ;;  %v526_v23 = vpop.f32.mrf.mxu1 }
 0x11b   :  { %v619_v8 = vpop.f32.mrf.mxu2  ;;  %v632_v0 = vpop.f32.mrf.mxu3 }
 0x11c   :  { %v620_v45 = vadd.f32 %v619_v8, %v513_v18  ;;  %v633_v48 = vadd.f32 %v632_v0, %v526_v23 }
 0x11e   :  { %v642_v39 = vadd.f32 %v4618_v58, %v620_v45  ;;  %v643_v19 = vadd.f32 %v4620_v61, %v633_v48 }
 0x120   :  { %v644_v14 = vmax.f32 %v642_v39, 0.0  ;;  %v645_v7 = vmax.f32 %v643_v19, 0.0 }
 0x121   :  { %v515_v10 = vpop.f32.mrf.mxu0  ;;  %v528_v24 = vpop.f32.mrf.mxu1 }
 0x122   :  { %v646_v34 = vpack.c.bf16 %v644_v14, %v644_v14  ;;  %v647_v38 = vpack.c.bf16 %v645_v7, %v645_v7 }
 0x123   :  { %v621_v60 = vpop.f32.mrf.mxu2  ;;  %v634_v18 = vpop.f32.mrf.mxu3 }
 0x124   :  { %1104 = vmatmul.bf16.vlgmr.msrb.gmra.mxu0 %v646_v34  ;;  %1117 = vmatmul.bf16.vlgmr.msrb.gmra.mxu1 %v647_v38 }
 0x129   :  { %v769_v23 = vpop.f32.mrf.mxu0  ;;  %v782_v8 = vpop.f32.mrf.mxu1 }
 0x12b   :  { %v795_v0 = vpop.f32.mrf.mxu2  ;;  %v808_v45 = vpop.f32.mrf.mxu3 }
 0x12c   :  { %v796_v10 = vadd.f32 %v795_v0, %v769_v23  ;;  %v809_v24 = vadd.f32 %v808_v45, %v782_v8  ;;  %v5356_v23 = vld [vmem:[#allocation5_spill] sm:$0xff]  ;;  %v5359_v8 = vld [vmem:[#allocation7_spill] sm:$0xff]  ;;  %v1175_v0 = vunpack.c.h.b16 %v4521_v52 }
 0x12e   :  { %v4653_v45 = vpack.c.b16 %v1175_v0, %v1175_v0  ;;  %v3608_v0 = vld [vmem:[%s5323_s7 + $0x158] sm:$0xff] }
 0x131   :  { %v771_v6 = vpop.f32.mrf.mxu0  ;;  %v784_v48 = vpop.f32.mrf.mxu1 }
 0x133   :  { %v797_v39 = vpop.f32.mrf.mxu2  ;;  %v810_v19 = vpop.f32.mrf.mxu3 }
 0x134   :  { %1156 = vmatmul.bf16.vlgmr.msra.gmra.mxu0 %v4521_v52  ;;  %1169 = vmatmul.bf16.vlgmr.msra.gmra.mxu1 %v4521_v52 }
 0x139   :  { %v821_v14 = vpop.f32.mrf.mxu0  ;;  %v834_v7 = vpop.f32.mrf.mxu1 }
 0x13a   :  { %v838_v60 = vadd.f32 %v821_v14, %v796_v10  ;;  %v839_v18 = vadd.f32 %v834_v7, %v809_v24  ;;  %v3604_v10 = vld [vmem:[%s5323_s7 + $0x138] sm:$0xff] }
 0x13b   :  { %v3612_v24 = vld [vmem:[%s5323_s7 + $0x178] sm:$0xff]  ;;  %1340 = vmatpush.bf16.msrb.mxu0 %v3604_v10 }
 0x13c   :  { %v840_v34 = vadd.f32 %v838_v60, %v4618_v58  ;;  %v841_v38 = vadd.f32 %v839_v18, %v4620_v61  ;;  %1353 = vmatpush.bf16.msrb.mxu1 %v3612_v24  ;;  %v3603_v60 = vld [vmem:[%s5323_s7 + $0x130] sm:$0xff] }
 0x13d   :  { %v3611_v18 = vld [vmem:[%s5323_s7 + $0x170] sm:$0xff] }
 0x13e   :  { %v842_v37 = vmax.f32 %v840_v34, 0.0  ;;  %v843_v33 = vmax.f32 %v841_v38, 0.0  ;;  %v3602_v34 = vld [vmem:[%s5323_s7 + $0x128] sm:$0xff] }
 0x13f   :  { %1341 = vmatpush.bf16.msrb.mxu0 %v3603_v60  ;;  %v3610_v38 = vld [vmem:[%s5323_s7 + $0x168] sm:$0xff]  ;;  %v3599_v60 = vld [vmem:[%s5323_s7 + $0x110] sm:$0xff] }
 0x140   :  { %v844_v6 = vpack.c.bf16 %v842_v37, %v842_v37  ;;  %v845_v48 = vpack.c.bf16 %v843_v33, %v843_v33  ;;  %v5357_v37 = vld [vmem:[#allocation6_spill] sm:$0xff]  ;;  %v5358_v33 = vld [vmem:[#allocation12_spill] sm:$0xff]  ;;  %1354 = vmatpush.bf16.msrb.mxu1 %v3611_v18 }
 0x141   :  { %v823_v39 = vpop.f32.mrf.mxu0  ;;  %v836_v19 = vpop.f32.mrf.mxu1  ;;  %v3607_v18 = vld [vmem:[%s5323_s7 + $0x150] sm:$0xff] }
 0x142   :  { %982 = vmatmul.bf16.vlgmr.msra.gmra.mxu2 %v844_v6  ;;  %995 = vmatmul.bf16.vlgmr.msra.gmra.mxu3 %v845_v48  ;;  %v3601_v39 = vld [vmem:[%s5323_s7 + $0x120] sm:$0xff] }
 0x143   :  { %1178 = vmatpush.bf16.msra.mxu2 %v3992_v30  ;;  %1191 = vmatpush.bf16.msra.mxu3 %v3997_v32  ;;  %v3609_v19 = vld [vmem:[%s5323_s7 + $0x160] sm:$0xff] }
 0x144   :  { %1342 = vmatpush.bf16.msrb.mxu0 %v3602_v34  ;;  %1355 = vmatpush.bf16.msrb.mxu1 %v3610_v38  ;;  %v3598_v34 = vld [vmem:[%s5323_s7 + $0x108] sm:$0xff] }
 0x145   :  { %v3606_v38 = vld [vmem:[%s5323_s7 + $0x148] sm:$0xff] }
 0x147   :  { %1179 = vmatpush.bf16.msra.mxu2 %v4027_v44  ;;  %1192 = vmatpush.bf16.msra.mxu3 %v4036_v47 }
 0x148   :  { %1343 = vmatpush.bf16.msrb.mxu0 %v3601_v39  ;;  %1356 = vmatpush.bf16.msrb.mxu1 %v3609_v19  ;;  %v3597_v39 = vld [vmem:[%s5323_s7 + $0x100] sm:$0xff] }
 0x149   :  { %v3605_v19 = vld [vmem:[%s5323_s7 + $0x140] sm:$0xff] }
 0x14b   :  { %1180 = vmatpush.bf16.msra.mxu2 %v4061_v59  ;;  %1193 = vmatpush.bf16.msra.mxu3 %v4070_v62 }
 0x14c   :  { %1357 = vmatpush.bf16.msrb.mxu1 %v3608_v0 }
 0x14f   :  { %1181 = vmatpush.bf16.msra.mxu2 %v5356_v23  ;;  %1194 = vmatpush.bf16.msra.mxu3 %v5357_v37 }
 0x150   :  { %1358 = vmatpush.bf16.msrb.mxu1 %v3607_v18 }
 0x152   :  { %1130 = vmatmul.bf16.vlgmr.msrb.gmra.mxu2 %v5358_v33  ;;  %1143 = vmatmul.bf16.vlgmr.msrb.gmra.mxu3 %v5358_v33  ;;  %v3600_v33 = vld [vmem:[%s5323_s7 + $0x118] sm:$0xff] }
 0x153   :  { %1182 = vmatpush.bf16.msra.mxu2 %v5359_v8  ;;  %1195 = vmatpush.bf16.msra.mxu3 %v4150_v22 }
 0x154   :  { %1344 = vmatpush.bf16.msrb.mxu0 %v3600_v33  ;;  %1359 = vmatpush.bf16.msrb.mxu1 %v3606_v38 }
 0x157   :  { %1183 = vmatpush.bf16.msra.mxu2 %v4177_v31  ;;  %1196 = vmatpush.bf16.msra.mxu3 %v4186_v35 }
 0x158   :  { %1345 = vmatpush.bf16.msrb.mxu0 %v3599_v60  ;;  %1360 = vmatpush.bf16.msrb.mxu1 %v3605_v19 }
 0x15b   :  { %1184 = vmatpush.bf16.msra.mxu2 %v4222_v49  ;;  %1197 = vmatpush.bf16.msra.mxu3 %v4228_v51 }
 0x15c   :  { %1346 = vmatpush.bf16.msrb.mxu0 %v3598_v34  ;;  %1406 = vmatpush.bf16.msra.mxu1 %v4052_v56 }
 0x15f   :  { %1185 = vmatpush.bf16.msra.mxu2 %v4261_v5  ;;  %1198 = vmatpush.bf16.msra.mxu3 %v4270_v9 }
 0x160   :  { %1347 = vmatpush.bf16.msrb.mxu0 %v3597_v39  ;;  %1407 = vmatpush.bf16.msra.mxu1 %v4088_v4 }
 0x162   :  { %1186 = vmatmul.bf16.vlgmr.msra.gmra.mxu2 %v4653_v45  ;;  %1199 = vmatmul.bf16.vlgmr.msra.gmra.mxu3 %v4653_v45 }
 0x163   :  { %1367 = vmatpush.bf16.msrb.mxu2 %v4272_v11  ;;  %1380 = vmatpush.bf16.msrb.mxu3 %v4275_v12 }
 0x164   :  { %1393 = vmatpush.bf16.msra.mxu0 %v4050_v55  ;;  %1408 = vmatpush.bf16.msra.mxu1 %v4130_v16 }
 0x167   :  { %1368 = vmatpush.bf16.msrb.mxu2 %v4309_v28  ;;  %1381 = vmatpush.bf16.msrb.mxu3 %v4313_v29 }
 0x168   :  { %1394 = vmatpush.bf16.msra.mxu0 %v4085_v3  ;;  %1409 = vmatpush.bf16.msra.mxu1 %v4168_v27 }
 0x16b   :  { %1369 = vmatpush.bf16.msrb.mxu2 %v4333_v42  ;;  %1382 = vmatpush.bf16.msrb.mxu3 %v4337_v43 }
 0x16c   :  { %1395 = vmatpush.bf16.msra.mxu0 %v4125_v15  ;;  %1410 = vmatpush.bf16.msra.mxu1 %v4204_v41 }
 0x16f   :  { %1370 = vmatpush.bf16.msrb.mxu2 %v4355_v53  ;;  %1383 = vmatpush.bf16.msrb.mxu3 %v4358_v54 }
 0x170   :  { %1396 = vmatpush.bf16.msra.mxu0 %v4165_v26  ;;  %1411 = vmatpush.bf16.msra.mxu1 %v4249_v63 }
 0x173   :  { %1371 = vmatpush.bf16.msrb.mxu2 %v4375_v1  ;;  %1384 = vmatpush.bf16.msrb.mxu3 %v4378_v2 }
 0x174   :  { %1397 = vmatpush.bf16.msra.mxu0 %v4201_v40  ;;  %1412 = vmatpush.bf16.msra.mxu1 %v4289_v20 }
 0x177   :  { %1372 = vmatpush.bf16.msrb.mxu2 %v4403_v17  ;;  %1385 = vmatpush.bf16.msrb.mxu3 %v4408_v21 }
 0x178   :  { %1398 = vmatpush.bf16.msra.mxu0 %v4237_v57 }
 0x17b   :  { %1373 = vmatpush.bf16.msrb.mxu2 %v4421_v25  ;;  %1386 = vmatpush.bf16.msrb.mxu3 %v4426_v36 }
 0x17c   :  { %1399 = vmatpush.bf16.msra.mxu0 %v4277_v13 }
 0x17f   :  { %1374 = vmatpush.bf16.msrb.mxu2 %v4439_v46  ;;  %1387 = vmatpush.bf16.msrb.mxu3 %v4444_v50 }
 0x182   :  { %1375 = vmatmul.bf16.vlgmr.msrb.gmra.mxu2 %v4521_v52  ;;  %1388 = vmatmul.bf16.vlgmr.msrb.gmra.mxu3 %v4521_v52  ;;  %v5360_v52 = vld [vmem:[#allocation13_spill] sm:$0xff] }
 0x183   :  { %1419 = vmatpush.bf16.msra.mxu2 %v3992_v30  ;;  %1432 = vmatpush.bf16.msra.mxu3 %v3997_v32 }
 0x187   :  { %1420 = vmatpush.bf16.msra.mxu2 %v4027_v44  ;;  %1433 = vmatpush.bf16.msra.mxu3 %v4036_v47 }
 0x18b   :  { %1421 = vmatpush.bf16.msra.mxu2 %v4061_v59  ;;  %1434 = vmatpush.bf16.msra.mxu3 %v4070_v62 }
 0x18f   :  { %1422 = vmatpush.bf16.msra.mxu2 %v5356_v23  ;;  %1435 = vmatpush.bf16.msra.mxu3 %v5357_v37 }
 0x193   :  { %1423 = vmatpush.bf16.msra.mxu2 %v5359_v8  ;;  %1436 = vmatpush.bf16.msra.mxu3 %v4150_v22 }
 0x197   :  { %1424 = vmatpush.bf16.msra.mxu2 %v4177_v31  ;;  %1437 = vmatpush.bf16.msra.mxu3 %v4186_v35 }
 0x19b   :  { %1425 = vmatpush.bf16.msra.mxu2 %v4222_v49  ;;  %1438 = vmatpush.bf16.msra.mxu3 %v4228_v51 }
 0x19f   :  { %1426 = vmatpush.bf16.msra.mxu2 %v4261_v5  ;;  %1439 = vmatpush.bf16.msra.mxu3 %v4270_v9 }
 0x1a1   :  { %v4701_v14 = vpop.f32.mrf.mxu0  ;;  %v4703_v7 = vpop.f32.mrf.mxu1 }
 0x1a2   :  { %1427 = vmatmul.bf16.vlgmr.msra.gmra.mxu2 %v5360_v52  ;;  %1440 = vmatmul.bf16.vlgmr.msra.gmra.mxu3 %v5360_v52 }
 0x1a3   :  { %1608 = vmatpush.bf16.msrb.mxu2 %v4272_v11  ;;  %1621 = vmatpush.bf16.msrb.mxu3 %v4275_v12 }
 0x1a7   :  { %1609 = vmatpush.bf16.msrb.mxu2 %v4309_v28  ;;  %1622 = vmatpush.bf16.msrb.mxu3 %v4313_v29 }
 0x1a9   :  { %v1107_v6 = vpop.f32.mrf.mxu0  ;;  %v1120_v48 = vpop.f32.mrf.mxu1 }
 0x1ab   :  { %1610 = vmatpush.bf16.msrb.mxu2 %v4333_v42  ;;  %1623 = vmatpush.bf16.msrb.mxu3 %v4337_v43 }
 0x1af   :  { %1611 = vmatpush.bf16.msrb.mxu2 %v4355_v53  ;;  %1624 = vmatpush.bf16.msrb.mxu3 %v4358_v54 }
 0x1b1   :  { %v4737_v10 = vpop.f32.mrf.mxu0  ;;  %v4739_v24 = vpop.f32.mrf.mxu1 }
 0x1b3   :  { %1612 = vmatpush.bf16.msrb.mxu2 %v4375_v1  ;;  %1625 = vmatpush.bf16.msrb.mxu3 %v4378_v2 }
 0x1b7   :  { %1613 = vmatpush.bf16.msrb.mxu2 %v4403_v17  ;;  %1626 = vmatpush.bf16.msrb.mxu3 %v4408_v21 }
 0x1b9   :  { %v1159_v6 = vpop.f32.mrf.mxu0  ;;  %v1172_v48 = vpop.f32.mrf.mxu1 }
 0x1bb   :  { %1614 = vmatpush.bf16.msrb.mxu2 %v4421_v25  ;;  %1627 = vmatpush.bf16.msrb.mxu3 %v4426_v36 }
 0x1bf   :  { %1615 = vmatpush.bf16.msrb.mxu2 %v4439_v46  ;;  %1628 = vmatpush.bf16.msrb.mxu3 %v4444_v50 }
 0x1c2   :  { %1616 = vmatmul.bf16.vlgmr.msrb.gmra.mxu2 %v4653_v45  ;;  %1629 = vmatmul.bf16.vlgmr.msrb.gmra.mxu3 %v4653_v45 }
 0x1c3   :  { %1664 = vmatpush.bf16.msra.mxu2 %v3992_v30  ;;  %1677 = vmatpush.bf16.msra.mxu3 %v3997_v32 }
 0x1c5   :  { %v983_v33 = vpop.f32.mrf.mxu2  ;;  %v996_v0 = vpop.f32.mrf.mxu3 }
 0x1c6   :  { %v997_v60 = vadd.f32 %v996_v0, %v983_v33  ;;  %v5361_v0 = vld [vmem:[#allocation10_spill] sm:$0xff] }
 0x1c7   :  { %1665 = vmatpush.bf16.msra.mxu2 %v4027_v44  ;;  %1678 = vmatpush.bf16.msra.mxu3 %v4036_v47 }
 0x1c8   :  { %v1106_v18 = vadd.f32 %v4701_v14, %v997_v60  ;;  %v1661_v14 = vunpack.c.h.b16 %v5360_v52  ;;  %1400 = vmatpush.bf16.msra.mxu0 %v5361_v0  ;;  %v5362_v60 = vld [vmem:[#allocation11_spill] sm:$0xff] }
 0x1c9   :  { %1413 = vmatpush.bf16.msra.mxu1 %v5362_v60 }
 0x1ca   :  { %v4783_v34 = vadd.f32 %v4703_v7, %v1106_v18  ;;  %v4798_v7 = vpack.c.b16 %v1661_v14, %v1661_v14 }
 0x1cb   :  { %1666 = vmatpush.bf16.msra.mxu2 %v4061_v59  ;;  %1679 = vmatpush.bf16.msra.mxu3 %v4070_v62 }
 0x1cd   :  { %v985_v38 = vpop.f32.mrf.mxu2  ;;  %v998_v6 = vpop.f32.mrf.mxu3 }
 0x1cf   :  { %1667 = vmatpush.bf16.msra.mxu2 %v5356_v23  ;;  %1680 = vmatpush.bf16.msra.mxu3 %v5357_v37 }
 0x1d3   :  { %1668 = vmatpush.bf16.msra.mxu2 %v5359_v8  ;;  %1681 = vmatpush.bf16.msra.mxu3 %v4150_v22 }
 0x1d5   :  { %v1131_v48 = vpop.f32.mrf.mxu2  ;;  %v1144_v39 = vpop.f32.mrf.mxu3 }
 0x1d6   :  { %v1158_v18 = vadd.f32 %v4737_v10, %v1131_v48  ;;  %v1171_v38 = vadd.f32 %v4739_v24, %v1144_v39 }
 0x1d7   :  { %1669 = vmatpush.bf16.msra.mxu2 %v4177_v31  ;;  %1682 = vmatpush.bf16.msra.mxu3 %v4186_v35 }
 0x1db   :  { %1670 = vmatpush.bf16.msra.mxu2 %v4222_v49  ;;  %1683 = vmatpush.bf16.msra.mxu3 %v4228_v51 }
 0x1dd   :  { %v1133_v19 = vpop.f32.mrf.mxu2  ;;  %v1146_v33 = vpop.f32.mrf.mxu3 }
 0x1df   :  { %1671 = vmatpush.bf16.msra.mxu2 %v4261_v5  ;;  %1684 = vmatpush.bf16.msra.mxu3 %v4270_v9 }
 0x1e2   :  { %1672 = vmatmul.bf16.vlgmr.msra.gmra.mxu2 %v4798_v7  ;;  %1685 = vmatmul.bf16.vlgmr.msra.gmra.mxu3 %v4798_v7 }
 0x1e3   :  { %1853 = vmatpush.bf16.msrb.mxu2 %v4272_v11  ;;  %1866 = vmatpush.bf16.msrb.mxu3 %v4275_v12 }
 0x1e5   :  { %v1187_v6 = vpop.f32.mrf.mxu2  ;;  %v1200_v14 = vpop.f32.mrf.mxu3 }
 0x1e6   :  { %v1204_v19 = vadd.f32 %v1187_v6, %v1158_v18  ;;  %v1205_v33 = vadd.f32 %v1200_v14, %v1171_v38 }
 0x1e7   :  { %1854 = vmatpush.bf16.msrb.mxu2 %v4309_v28  ;;  %1867 = vmatpush.bf16.msrb.mxu3 %v4313_v29 }
 0x1e8   :  { %v1206_v0 = vadd.f32 %v1204_v19, %v4618_v58  ;;  %v1207_v60 = vadd.f32 %v1205_v33, %v4620_v61  ;;  %v3625_v19 = vld [vmem:[%s5323_s7 + $0x1e0] sm:$0xff]  ;;  %v3624_v33 = vld [vmem:[%s5323_s7 + $0x1d8] sm:$0xff] }
 0x1ea   :  { %v1208_v20 = vmax.f32 %v1206_v0, 0.0  ;;  %v1209_v10 = vmax.f32 %v1207_v60, 0.0 }
 0x1eb   :  { %1855 = vmatpush.bf16.msrb.mxu2 %v4333_v42  ;;  %1868 = vmatpush.bf16.msrb.mxu3 %v4337_v43 }
 0x1ec   :  { %v1210_v48 = vpack.c.bf16 %v1208_v20, %v1208_v20  ;;  %v1211_v24 = vpack.c.bf16 %v1209_v10, %v1209_v10 }
 0x1ed   :  { %v1189_v39 = vpop.f32.mrf.mxu2  ;;  %v1202_v13 = vpop.f32.mrf.mxu3 }
 0x1ee   :  { %1348 = vmatmul.bf16.vlgmr.msrb.gmra.mxu0 %v1210_v48  ;;  %1361 = vmatmul.bf16.vlgmr.msrb.gmra.mxu1 %v1211_v24  ;;  %v5366_v24 = vld [vmem:[#allocation10_spill] sm:$0xff]  ;;  %v5367_v39 = vld [vmem:[#allocation11_spill] sm:$0xff] }
 0x1ef   :  { %1856 = vmatpush.bf16.msrb.mxu2 %v4355_v53  ;;  %1869 = vmatpush.bf16.msrb.mxu3 %v4358_v54 }
 0x1f3   :  { %1857 = vmatpush.bf16.msrb.mxu2 %v4375_v1  ;;  %1870 = vmatpush.bf16.msrb.mxu3 %v4378_v2 }
 0x1f7   :  { %1858 = vmatpush.bf16.msrb.mxu2 %v4403_v17  ;;  %1871 = vmatpush.bf16.msrb.mxu3 %v4408_v21 }
 0x1fb   :  { %1859 = vmatpush.bf16.msrb.mxu2 %v4421_v25  ;;  %1872 = vmatpush.bf16.msrb.mxu3 %v4426_v36 }
 0x1fe   :  { %1401 = vmatmul.bf16.vlgmr.msra.gmra.mxu0 %v4653_v45  ;;  %1414 = vmatmul.bf16.vlgmr.msra.gmra.mxu1 %v4653_v45  ;;  %v5363_v45 = vld [vmem:[#allocation14_spill] sm:$0xff] }
 0x1ff   :  { %1860 = vmatpush.bf16.msrb.mxu2 %v4439_v46  ;;  %1873 = vmatpush.bf16.msrb.mxu3 %v4444_v50 }
 0x202   :  { %1861 = vmatmul.bf16.vlgmr.msrb.gmra.mxu2 %v5360_v52  ;;  %1874 = vmatmul.bf16.vlgmr.msrb.gmra.mxu3 %v5360_v52 }
 0x203   :  { %1905 = vmatpush.bf16.msra.mxu2 %v3992_v30  ;;  %1918 = vmatpush.bf16.msra.mxu3 %v3997_v32 }
 0x205   :  { %v4840_v13 = vpop.f32.mrf.mxu2  ;;  %v4842_v20 = vpop.f32.mrf.mxu3 }
 0x207   :  { %1906 = vmatpush.bf16.msra.mxu2 %v4027_v44  ;;  %1919 = vmatpush.bf16.msra.mxu3 %v4036_v47 }
 0x20b   :  { %1907 = vmatpush.bf16.msra.mxu2 %v4061_v59  ;;  %1920 = vmatpush.bf16.msra.mxu3 %v4070_v62 }
 0x20d   :  { %v1378_v0 = vpop.f32.mrf.mxu2  ;;  %v1391_v60 = vpop.f32.mrf.mxu3 }
 0x20f   :  { %1908 = vmatpush.bf16.msra.mxu2 %v5356_v23  ;;  %1921 = vmatpush.bf16.msra.mxu3 %v5357_v37 }
 0x213   :  { %1909 = vmatpush.bf16.msra.mxu2 %v5359_v8  ;;  %1922 = vmatpush.bf16.msra.mxu3 %v4150_v22 }
 0x217   :  { %1910 = vmatpush.bf16.msra.mxu2 %v4177_v31  ;;  %1923 = vmatpush.bf16.msra.mxu3 %v4186_v35 }
 0x21b   :  { %1911 = vmatpush.bf16.msra.mxu2 %v4222_v49  ;;  %1924 = vmatpush.bf16.msra.mxu3 %v4228_v51 }
 0x21f   :  { %1912 = vmatpush.bf16.msra.mxu2 %v4261_v5  ;;  %1925 = vmatpush.bf16.msra.mxu3 %v4270_v9 }
 0x222   :  { %1913 = vmatmul.bf16.vlgmr.msra.gmra.mxu2 %v5363_v45  ;;  %1926 = vmatmul.bf16.vlgmr.msra.gmra.mxu3 %v5363_v45 }
 0x223   :  { %2094 = vmatpush.bf16.msrb.mxu2 %v4272_v11  ;;  %2107 = vmatpush.bf16.msrb.mxu3 %v4275_v12 }
 0x225   :  { %v4862_v18 = vpop.f32.mrf.mxu2  ;;  %v4864_v38 = vpop.f32.mrf.mxu3 }
 0x227   :  { %2095 = vmatpush.bf16.msrb.mxu2 %v4309_v28  ;;  %2108 = vmatpush.bf16.msrb.mxu3 %v4313_v29 }
 0x22b   :  { %2096 = vmatpush.bf16.msrb.mxu2 %v4333_v42  ;;  %2109 = vmatpush.bf16.msrb.mxu3 %v4337_v43 }
 0x22d   :  { %v1430_v6 = vpop.f32.mrf.mxu2  ;;  %v1443_v14 = vpop.f32.mrf.mxu3 }
 0x22f   :  { %2097 = vmatpush.bf16.msrb.mxu2 %v4355_v53  ;;  %2110 = vmatpush.bf16.msrb.mxu3 %v4358_v54 }
 0x233   :  { %2098 = vmatpush.bf16.msrb.mxu2 %v4375_v1  ;;  %2111 = vmatpush.bf16.msrb.mxu3 %v4378_v2 }
 0x237   :  { %2099 = vmatpush.bf16.msrb.mxu2 %v4403_v17  ;;  %2112 = vmatpush.bf16.msrb.mxu3 %v4408_v21 }
 0x23b   :  { %2100 = vmatpush.bf16.msrb.mxu2 %v4421_v25  ;;  %2113 = vmatpush.bf16.msrb.mxu3 %v4426_v36 }
 0x23f   :  { %2101 = vmatpush.bf16.msrb.mxu2 %v4439_v46  ;;  %2114 = vmatpush.bf16.msrb.mxu3 %v4444_v50 }
 0x242   :  { %2102 = vmatmul.bf16.vlgmr.msrb.gmra.mxu2 %v4798_v7  ;;  %2115 = vmatmul.bf16.vlgmr.msrb.gmra.mxu3 %v4798_v7 }
 0x243   :  { %2150 = vmatpush.bf16.msra.mxu2 %v3992_v30  ;;  %2163 = vmatpush.bf16.msra.mxu3 %v3997_v32  ;;  %v3620_v30 = vld [vmem:[%s5323_s7 + $0x1b8] sm:$0xff] }
 0x244   :  { %v3628_v32 = vld [vmem:[%s5323_s7 + $0x1f8] sm:$0xff]  ;;  %1581 = vmatpush.bf16.msrb.mxu0 %v3620_v30 }
 0x245   :  { %1594 = vmatpush.bf16.msrb.mxu1 %v3628_v32 }
 0x247   :  { %2151 = vmatpush.bf16.msra.mxu2 %v4027_v44  ;;  %2164 = vmatpush.bf16.msra.mxu3 %v4036_v47  ;;  %v4890_v44 = vpop.f32.mrf.mxu2  ;;  %v4892_v47 = vpop.f32.mrf.mxu3 }
 0x24b   :  { %2152 = vmatpush.bf16.msra.mxu2 %v4061_v59  ;;  %2165 = vmatpush.bf16.msra.mxu3 %v4070_v62  ;;  %v3619_v59 = vld [vmem:[%s5323_s7 + $0x1b0] sm:$0xff] }
 0x24c   :  { %v3627_v62 = vld [vmem:[%s5323_s7 + $0x1f0] sm:$0xff]  ;;  %1582 = vmatpush.bf16.msrb.mxu0 %v3619_v59 }
 0x24d   :  { %1595 = vmatpush.bf16.msrb.mxu1 %v3627_v62 }
 0x24f   :  { %2153 = vmatpush.bf16.msra.mxu2 %v5356_v23  ;;  %2166 = vmatpush.bf16.msra.mxu3 %v5357_v37  ;;  %v3626_v23 = vld [vmem:[%s5323_s7 + $0x1e8] sm:$0xff]  ;;  %v1619_v37 = vpop.f32.mrf.mxu2 }
 0x251   :  { %1596 = vmatpush.bf16.msrb.mxu1 %v3626_v23 }
 0x253   :  { %2154 = vmatpush.bf16.msra.mxu2 %v5359_v8  ;;  %2167 = vmatpush.bf16.msra.mxu3 %v4150_v22  ;;  %v3618_v22 = vld [vmem:[%s5323_s7 + $0x1a8] sm:$0xff]  ;;  %v1632_v8 = vpop.f32.mrf.mxu3 }
 0x254   :  { %1583 = vmatpush.bf16.msrb.mxu0 %v3618_v22 }
 0x255   :  { %1597 = vmatpush.bf16.msrb.mxu1 %v3625_v19 }
 0x257   :  { %2155 = vmatpush.bf16.msra.mxu2 %v4177_v31  ;;  %2168 = vmatpush.bf16.msra.mxu3 %v4186_v35  ;;  %v2147_v31 = vunpack.c.h.b16 %v5363_v45  ;;  %v3617_v35 = vld [vmem:[%s5323_s7 + $0x1a0] sm:$0xff] }
 0x258   :  { %1584 = vmatpush.bf16.msrb.mxu0 %v3617_v35 }
 0x259   :  { %1598 = vmatpush.bf16.msrb.mxu1 %v3624_v33 }
 0x25b   :  { %2156 = vmatpush.bf16.msra.mxu2 %v4222_v49  ;;  %2169 = vmatpush.bf16.msra.mxu3 %v4228_v51  ;;  %v4921_v49 = vpack.c.b16 %v2147_v31, %v2147_v31  ;;  %v3616_v51 = vld [vmem:[%s5323_s7 + $0x198] sm:$0xff] }
 0x25c   :  { %1585 = vmatpush.bf16.msrb.mxu0 %v3616_v51 }
 0x25f   :  { %2157 = vmatpush.bf16.msra.mxu2 %v4261_v5  ;;  %2170 = vmatpush.bf16.msra.mxu3 %v4270_v9  ;;  %v3615_v5 = vld [vmem:[%s5323_s7 + $0x190] sm:$0xff] }
 0x260   :  { %v3623_v9 = vld [vmem:[%s5323_s7 + $0x1d0] sm:$0xff]  ;;  %1586 = vmatpush.bf16.msrb.mxu0 %v3615_v5 }
 0x261   :  { %1599 = vmatpush.bf16.msrb.mxu1 %v3623_v9 }
 0x262   :  { %2158 = vmatmul.bf16.vlgmr.msra.gmra.mxu2 %v4921_v49  ;;  %2171 = vmatmul.bf16.vlgmr.msra.gmra.mxu3 %v4921_v49 }
 0x263   :  { %2339 = vmatpush.bf16.msrb.mxu2 %v4272_v11  ;;  %2352 = vmatpush.bf16.msrb.mxu3 %v4275_v12  ;;  %v3614_v11 = vld [vmem:[%s5323_s7 + $0x188] sm:$0xff] }
 0x264   :  { %v3622_v12 = vld [vmem:[%s5323_s7 + $0x1c8] sm:$0xff]  ;;  %1587 = vmatpush.bf16.msrb.mxu0 %v3614_v11 }
 0x265   :  { %1600 = vmatpush.bf16.msrb.mxu1 %v3622_v12 }
 0x267   :  { %2340 = vmatpush.bf16.msrb.mxu2 %v4309_v28  ;;  %2353 = vmatpush.bf16.msrb.mxu3 %v4313_v29  ;;  %v3613_v28 = vld [vmem:[%s5323_s7 + $0x180] sm:$0xff] }
 0x268   :  { %v3621_v29 = vld [vmem:[%s5323_s7 + $0x1c0] sm:$0xff]  ;;  %1588 = vmatpush.bf16.msrb.mxu0 %v3613_v28  ;;  %v3636_v28 = vld [vmem:[%s5323_s7 + $0x238] sm:$0xff] }
 0x269   :  { %1601 = vmatpush.bf16.msrb.mxu1 %v3621_v29  ;;  %v3635_v29 = vld [vmem:[%s5323_s7 + $0x230] sm:$0xff] }
 0x26b   :  { %2341 = vmatpush.bf16.msrb.mxu2 %v4333_v42  ;;  %2354 = vmatpush.bf16.msrb.mxu3 %v4337_v43  ;;  %v4957_v42 = vpop.f32.mrf.mxu2  ;;  %v4959_v43 = vpop.f32.mrf.mxu3 }
 0x26c   :  { %1634 = vmatpush.bf16.msra.mxu0 %v4050_v55 }
 0x26d   :  { %1647 = vmatpush.bf16.msra.mxu1 %v4052_v56 }
 0x26f   :  { %2342 = vmatpush.bf16.msrb.mxu2 %v4355_v53  ;;  %2355 = vmatpush.bf16.msrb.mxu3 %v4358_v54 }
 0x270   :  { %1635 = vmatpush.bf16.msra.mxu0 %v4085_v3 }
 0x271   :  { %1648 = vmatpush.bf16.msra.mxu1 %v4088_v4 }
 0x273   :  { %2343 = vmatpush.bf16.msrb.mxu2 %v4375_v1  ;;  %2356 = vmatpush.bf16.msrb.mxu3 %v4378_v2  ;;  %v1675_v53 = vpop.f32.mrf.mxu2  ;;  %v1688_v54 = vpop.f32.mrf.mxu3 }
 0x274   :  { %1636 = vmatpush.bf16.msra.mxu0 %v4125_v15  ;;  %v1349_v1 = vpop.f32.mrf.mxu0  ;;  %v1362_v2 = vpop.f32.mrf.mxu1  ;;  %v3643_v53 = vld [vmem:[%s5323_s7 + $0x270] sm:$0xff] }
 0x275   :  { %1649 = vmatpush.bf16.msra.mxu1 %v4130_v16 }
 0x277   :  { %2344 = vmatpush.bf16.msrb.mxu2 %v4403_v17  ;;  %2357 = vmatpush.bf16.msrb.mxu3 %v4408_v21  ;;  %v1363_v17 = vadd.f32 %v1362_v2, %v1349_v1  ;;  %v3634_v2 = vld [vmem:[%s5323_s7 + $0x228] sm:$0xff] }
 0x278   :  { %1637 = vmatpush.bf16.msra.mxu0 %v4165_v26 }
 0x279   :  { %1650 = vmatpush.bf16.msra.mxu1 %v4168_v27  ;;  %v4980_v21 = vadd.f32 %v1363_v17, %v4783_v34  ;;  %v3642_v17 = vld [vmem:[%s5323_s7 + $0x268] sm:$0xff] }
 0x27b   :  { %2345 = vmatpush.bf16.msrb.mxu2 %v4421_v25  ;;  %2358 = vmatpush.bf16.msrb.mxu3 %v4426_v36  ;;  %v5364_v25 = vld [vmem:[#allocation8_spill] sm:$0xff]  ;;  %v5365_v36 = vld [vmem:[#allocation9_spill] sm:$0xff] }
 0x27c   :  { %1638 = vmatpush.bf16.msra.mxu0 %v4201_v40 }
 0x27d   :  { %1651 = vmatpush.bf16.msra.mxu1 %v4204_v41 }
 0x27f   :  { %2346 = vmatpush.bf16.msrb.mxu2 %v4439_v46  ;;  %2359 = vmatpush.bf16.msrb.mxu3 %v4444_v50  ;;  %v1351_v46 = vpop.f32.mrf.mxu0  ;;  %v1364_v50 = vpop.f32.mrf.mxu1 }
 0x280   :  { %1639 = vmatpush.bf16.msra.mxu0 %v4237_v57  ;;  %v3633_v46 = vld [vmem:[%s5323_s7 + $0x220] sm:$0xff] }
 0x281   :  { %1652 = vmatpush.bf16.msra.mxu1 %v4249_v63  ;;  %v3641_v50 = vld [vmem:[%s5323_s7 + $0x260] sm:$0xff] }
 0x282   :  { %2347 = vmatmul.bf16.vlgmr.msrb.gmra.mxu2 %v5363_v45  ;;  %2360 = vmatmul.bf16.vlgmr.msrb.gmra.mxu3 %v5363_v45 }
 0x284   :  { %1640 = vmatpush.bf16.msra.mxu0 %v5364_v25 }
 0x285   :  { %1653 = vmatpush.bf16.msra.mxu1 %v5365_v36  ;;  %v4986_v10 = vpop.f32.mrf.mxu2  ;;  %v4988_v48 = vpop.f32.mrf.mxu3 }
 0x287   :  { %v1402_v34 = vpop.f32.mrf.mxu0  ;;  %v1415_v0 = vpop.f32.mrf.mxu1 }
 0x288   :  { %1641 = vmatpush.bf16.msra.mxu0 %v5366_v24  ;;  %v1403_v60 = vadd.f32 %v1402_v34, %v4840_v13  ;;  %v1416_v6 = vadd.f32 %v1415_v0, %v4842_v20  ;;  %v3632_v34 = vld [vmem:[%s5323_s7 + $0x218] sm:$0xff] }
 0x289   :  { %1654 = vmatpush.bf16.msra.mxu1 %v5367_v39  ;;  %v3640_v0 = vld [vmem:[%s5323_s7 + $0x258] sm:$0xff] }
 0x28a   :  { %v1445_v14 = vadd.f32 %v4862_v18, %v1403_v60  ;;  %v1446_v30 = vadd.f32 %v4864_v38, %v1416_v6  ;;  %v3631_v60 = vld [vmem:[%s5323_s7 + $0x210] sm:$0xff] }
 0x28b   :  { %v3639_v6 = vld [vmem:[%s5323_s7 + $0x250] sm:$0xff] }
 0x28c   :  { %v1447_v62 = vadd.f32 %v1445_v14, %v4618_v58  ;;  %v1448_v22 = vadd.f32 %v1446_v30, %v4620_v61  ;;  %v3630_v14 = vld [vmem:[%s5323_s7 + $0x208] sm:$0xff] }
 0x28d   :  { %v1864_v32 = vpop.f32.mrf.mxu2  ;;  %v1877_v59 = vpop.f32.mrf.mxu3  ;;  %v3638_v30 = vld [vmem:[%s5323_s7 + $0x248] sm:$0xff] }
 0x28e   :  { %v1449_v23 = vmax.f32 %v1447_v62, 0.0  ;;  %v1450_v37 = vmax.f32 %v1448_v22, 0.0  ;;  %v3629_v62 = vld [vmem:[%s5323_s7 + $0x200] sm:$0xff] }
 0x28f   :  { %v1404_v8 = vpop.f32.mrf.mxu0  ;;  %v1417_v31 = vpop.f32.mrf.mxu1  ;;  %v3637_v22 = vld [vmem:[%s5323_s7 + $0x240] sm:$0xff] }
 0x290   :  { %v1451_v35 = vpack.c.bf16 %v1449_v23, %v1449_v23  ;;  %v1452_v19 = vpack.c.bf16 %v1450_v37, %v1450_v37 }
 0x292   :  { %1589 = vmatmul.bf16.vlgmr.msrb.gmra.mxu0 %v1451_v35  ;;  %1602 = vmatmul.bf16.vlgmr.msrb.gmra.mxu1 %v1452_v19 }
 0x293   :  { %1826 = vmatpush.bf16.msrb.mxu0 %v3636_v28 }
 0x297   :  { %1827 = vmatpush.bf16.msrb.mxu0 %v3635_v29 }
 0x29b   :  { %1828 = vmatpush.bf16.msrb.mxu0 %v3634_v2 }
 0x29f   :  { %1829 = vmatpush.bf16.msrb.mxu0 %v3633_v46 }
 0x2a2   :  { %1642 = vmatmul.bf16.vlgmr.msra.gmra.mxu0 %v5360_v52  ;;  %1655 = vmatmul.bf16.vlgmr.msra.gmra.mxu1 %v5360_v52  ;;  %v3644_v52 = vld [vmem:[%s5323_s7 + $0x278] sm:$0xff] }
 0x2a3   :  { %1839 = vmatpush.bf16.msrb.mxu1 %v3644_v52  ;;  %1830 = vmatpush.bf16.msrb.mxu0 %v3632_v34  ;;  %v3659_v34 = vld [vmem:[%s5323_s7 + $0x2f0] sm:$0xff] }
 0x2a5   :  { %v4998_v13 = vpop.f32.mrf.mxu2  ;;  %v5000_v20 = vpop.f32.mrf.mxu3 }
 0x2a7   :  { %1840 = vmatpush.bf16.msrb.mxu1 %v3643_v53  ;;  %1831 = vmatpush.bf16.msrb.mxu0 %v3631_v60  ;;  %v3658_v60 = vld [vmem:[%s5323_s7 + $0x2e8] sm:$0xff] }
 0x2ab   :  { %1841 = vmatpush.bf16.msrb.mxu1 %v3642_v17  ;;  %1832 = vmatpush.bf16.msrb.mxu0 %v3630_v14  ;;  %v3657_v14 = vld [vmem:[%s5323_s7 + $0x2e0] sm:$0xff] }
 0x2ad   :  { %v1916_v18 = vpop.f32.mrf.mxu2  ;;  %v1929_v38 = vpop.f32.mrf.mxu3 }
 0x2af   :  { %1842 = vmatpush.bf16.msrb.mxu1 %v3641_v50  ;;  %1833 = vmatpush.bf16.msrb.mxu0 %v3629_v62  ;;  %v3652_v50 = vld [vmem:[%s5323_s7 + $0x2b8] sm:$0xff] }
 0x2b0   :  { %v3656_v62 = vld [vmem:[%s5323_s7 + $0x2d8] sm:$0xff] }
 0x2b3   :  { %1843 = vmatpush.bf16.msrb.mxu1 %v3640_v0  ;;  %1879 = vmatpush.bf16.msra.mxu0 %v4050_v55  ;;  %v3650_v0 = vld [vmem:[%s5323_s7 + $0x2a8] sm:$0xff] }
 0x2b7   :  { %1844 = vmatpush.bf16.msrb.mxu1 %v3639_v6  ;;  %1880 = vmatpush.bf16.msra.mxu0 %v4085_v3  ;;  %v3649_v6 = vld [vmem:[%s5323_s7 + $0x2a0] sm:$0xff] }
 0x2bb   :  { %1845 = vmatpush.bf16.msrb.mxu1 %v3638_v30  ;;  %1881 = vmatpush.bf16.msra.mxu0 %v4125_v15  ;;  %v3648_v30 = vld [vmem:[%s5323_s7 + $0x298] sm:$0xff] }
 0x2bf   :  { %1846 = vmatpush.bf16.msrb.mxu1 %v3637_v22  ;;  %1882 = vmatpush.bf16.msra.mxu0 %v4165_v26  ;;  %v3647_v22 = vld [vmem:[%s5323_s7 + $0x290] sm:$0xff] }
 0x2c3   :  { %1892 = vmatpush.bf16.msra.mxu1 %v4052_v56  ;;  %1883 = vmatpush.bf16.msra.mxu0 %v4201_v40 }
 0x2c5   :  { %v5004_v51 = vpop.f32.mrf.mxu2  ;;  %v5006_v33 = vpop.f32.mrf.mxu3 }
 0x2c7   :  { %1893 = vmatpush.bf16.msra.mxu1 %v4088_v4  ;;  %1884 = vmatpush.bf16.msra.mxu0 %v4237_v57 }
 0x2cb   :  { %1894 = vmatpush.bf16.msra.mxu1 %v4130_v16  ;;  %1885 = vmatpush.bf16.msra.mxu0 %v5364_v25 }
 0x2cd   :  { %v2105_v5 = vpop.f32.mrf.mxu2  ;;  %v2118_v9 = vpop.f32.mrf.mxu3 }
 0x2cf   :  { %1895 = vmatpush.bf16.msra.mxu1 %v4168_v27  ;;  %1886 = vmatpush.bf16.msra.mxu0 %v5366_v24 }
 0x2d3   :  { %1896 = vmatpush.bf16.msra.mxu1 %v4204_v41 }
 0x2d7   :  { %1897 = vmatpush.bf16.msra.mxu1 %v4249_v63 }
 0x2db   :  { %1898 = vmatpush.bf16.msra.mxu1 %v5365_v36 }
 0x2df   :  { %1899 = vmatpush.bf16.msra.mxu1 %v5367_v39 }
 0x2e5   :  { %v5008_v11 = vpop.f32.mrf.mxu2  ;;  %v5010_v12 = vpop.f32.mrf.mxu3 }
 0x2ed   :  { %v2161_v54 = vpop.f32.mrf.mxu2  ;;  %v2174_v1 = vpop.f32.mrf.mxu3 }
 0x305   :  { %v5054_v32 = vpop.f32.mrf.mxu2  ;;  %v5056_v59 = vpop.f32.mrf.mxu3 }
 0x30d   :  { %v2350_v23 = vpop.f32.mrf.mxu2  ;;  %v2363_v37 = vpop.f32.mrf.mxu3 }
 0x30e   :  { %v3655_v23 = vld [vmem:[%s5323_s7 + $0x2d0] sm:$0xff]  ;;  %v3646_v37 = vld [vmem:[%s5323_s7 + $0x288] sm:$0xff] }
 0x30f   :  { %v1590_v8 = vpop.f32.mrf.mxu0  ;;  %v1603_v31 = vpop.f32.mrf.mxu1 }
 0x310   :  { %v1604_v35 = vadd.f32 %v1603_v31, %v1590_v8  ;;  %v3645_v8 = vld [vmem:[%s5323_s7 + $0x280] sm:$0xff] }
 0x311   :  { %v3653_v31 = vld [vmem:[%s5323_s7 + $0x2c0] sm:$0xff] }
 0x312   :  { %v5077_v19 = vadd.f32 %v1604_v35, %v4980_v21 }
 0x317   :  { %v1592_v18 = vpop.f32.mrf.mxu0  ;;  %v1605_v38 = vpop.f32.mrf.mxu1 }
 0x31f   :  { %v1643_v5 = vpop.f32.mrf.mxu0  ;;  %v1656_v9 = vpop.f32.mrf.mxu1 }
 0x320   :  { %v1644_v28 = vadd.f32 %v1643_v5, %v4890_v44  ;;  %v1657_v52 = vadd.f32 %v1656_v9, %v4892_v47  ;;  %v3660_v44 = vld [vmem:[%s5323_s7 + $0x2f8] sm:$0xff] }
 0x322   :  { %v1690_v29 = vadd.f32 %v4957_v42, %v1644_v28  ;;  %v1691_v21 = vadd.f32 %v4959_v43, %v1657_v52  ;;  %v3651_v43 = vld [vmem:[%s5323_s7 + $0x2b0] sm:$0xff] }
 0x324   :  { %v1692_v53 = vadd.f32 %v1690_v29, %v4618_v58  ;;  %v1693_v54 = vadd.f32 %v1691_v21, %v4620_v61 }
 0x326   :  { %v1694_v1 = vmax.f32 %v1692_v53, 0.0  ;;  %v1695_v2 = vmax.f32 %v1693_v54, 0.0 }
 0x327   :  { %v1645_v17 = vpop.f32.mrf.mxu0  ;;  %v1658_v46 = vpop.f32.mrf.mxu1 }
 0x328   :  { %v1696_v47 = vpack.c.bf16 %v1694_v1, %v1694_v1  ;;  %v1697_v42 = vpack.c.bf16 %v1695_v2, %v1695_v2 }
 0x32a   :  { %1834 = vmatmul.bf16.vlgmr.msrb.gmra.mxu0 %v1696_v47  ;;  %1847 = vmatmul.bf16.vlgmr.msrb.gmra.mxu1 %v1697_v42  ;;  %v3668_v47 = vld [vmem:[%s5323_s7 + $0x338] sm:$0xff]  ;;  %v3675_v42 = vld [vmem:[%s5323_s7 + $0x370] sm:$0xff] }
 0x32b   :  { %2067 = vmatpush.bf16.msrb.mxu0 %v3652_v50  ;;  %2080 = vmatpush.bf16.msrb.mxu1 %v3660_v44 }
 0x32f   :  { %2068 = vmatpush.bf16.msrb.mxu0 %v3651_v43  ;;  %2081 = vmatpush.bf16.msrb.mxu1 %v3659_v34  ;;  %v3666_v43 = vld [vmem:[%s5323_s7 + $0x328] sm:$0xff] }
 0x330   :  { %v3674_v34 = vld [vmem:[%s5323_s7 + $0x368] sm:$0xff] }
 0x333   :  { %2069 = vmatpush.bf16.msrb.mxu0 %v3650_v0  ;;  %2082 = vmatpush.bf16.msrb.mxu1 %v3658_v60  ;;  %v3665_v0 = vld [vmem:[%s5323_s7 + $0x320] sm:$0xff] }
 0x334   :  { %v3673_v60 = vld [vmem:[%s5323_s7 + $0x360] sm:$0xff] }
 0x337   :  { %2070 = vmatpush.bf16.msrb.mxu0 %v3649_v6  ;;  %2083 = vmatpush.bf16.msrb.mxu1 %v3657_v14  ;;  %v3664_v6 = vld [vmem:[%s5323_s7 + $0x318] sm:$0xff] }
 0x338   :  { %v3672_v14 = vld [vmem:[%s5323_s7 + $0x358] sm:$0xff] }
 0x33a   :  { %1887 = vmatmul.bf16.vlgmr.msra.gmra.mxu0 %v4798_v7  ;;  %1900 = vmatmul.bf16.vlgmr.msra.gmra.mxu1 %v4798_v7  ;;  %v3654_v7 = vld [vmem:[%s5323_s7 + $0x2c8] sm:$0xff] }
 0x33b   :  { %2071 = vmatpush.bf16.msrb.mxu0 %v3648_v30  ;;  %2084 = vmatpush.bf16.msrb.mxu1 %v3656_v62  ;;  %v3663_v30 = vld [vmem:[%s5323_s7 + $0x310] sm:$0xff] }
 0x33c   :  { %v3671_v62 = vld [vmem:[%s5323_s7 + $0x350] sm:$0xff] }
 0x33f   :  { %2072 = vmatpush.bf16.msrb.mxu0 %v3647_v22  ;;  %2085 = vmatpush.bf16.msrb.mxu1 %v3655_v23  ;;  %v3662_v22 = vld [vmem:[%s5323_s7 + $0x308] sm:$0xff]  ;;  %v3661_v23 = vld [vmem:[%s5323_s7 + $0x300] sm:$0xff] }
 0x343   :  { %2073 = vmatpush.bf16.msrb.mxu0 %v3646_v37  ;;  %2086 = vmatpush.bf16.msrb.mxu1 %v3654_v7  ;;  %v3669_v37 = vld [vmem:[%s5323_s7 + $0x340] sm:$0xff] }
 0x347   :  { %2074 = vmatpush.bf16.msrb.mxu0 %v3645_v8  ;;  %2087 = vmatpush.bf16.msrb.mxu1 %v3653_v31 }
 0x34b   :  { %2120 = vmatpush.bf16.msra.mxu0 %v4050_v55  ;;  %2133 = vmatpush.bf16.msra.mxu1 %v4052_v56 }
 0x34f   :  { %2121 = vmatpush.bf16.msra.mxu0 %v4085_v3  ;;  %2134 = vmatpush.bf16.msra.mxu1 %v4088_v4 }
 0x353   :  { %2122 = vmatpush.bf16.msra.mxu0 %v4125_v15  ;;  %2135 = vmatpush.bf16.msra.mxu1 %v4130_v16 }
 0x357   :  { %2123 = vmatpush.bf16.msra.mxu0 %v4165_v26  ;;  %2136 = vmatpush.bf16.msra.mxu1 %v4168_v27 }
 0x35b   :  { %2124 = vmatpush.bf16.msra.mxu0 %v4201_v40  ;;  %2137 = vmatpush.bf16.msra.mxu1 %v4204_v41 }
 0x35f   :  { %2125 = vmatpush.bf16.msra.mxu0 %v4237_v57  ;;  %2138 = vmatpush.bf16.msra.mxu1 %v4249_v63 }
 0x363   :  { %2126 = vmatpush.bf16.msra.mxu0 %v5364_v25  ;;  %2139 = vmatpush.bf16.msra.mxu1 %v5365_v36 }
 0x367   :  { %2127 = vmatpush.bf16.msra.mxu0 %v5366_v24  ;;  %2140 = vmatpush.bf16.msra.mxu1 %v5367_v39 }
 0x3a7   :  { %v1835_v35 = vpop.f32.mrf.mxu0  ;;  %v1848_v18 = vpop.f32.mrf.mxu1 }
 0x3a8   :  { %v1849_v38 = vadd.f32 %v1848_v18, %v1835_v35 }
 0x3aa   :  { %v5152_v5 = vadd.f32 %v1849_v38, %v5077_v19 }
 0x3af   :  { %v1837_v9 = vpop.f32.mrf.mxu0  ;;  %v1850_v28 = vpop.f32.mrf.mxu1 }
 0x3b0   :  { %v3688_v28 = vld [vmem:[%s5323_s7 + $0x3d8] sm:$0xff] }
 0x3b7   :  { %v1888_v52 = vpop.f32.mrf.mxu0  ;;  %v1901_v29 = vpop.f32.mrf.mxu1 }
 0x3b8   :  { %v1889_v21 = vadd.f32 %v1888_v52, %v4986_v10  ;;  %v1902_v53 = vadd.f32 %v1901_v29, %v4988_v48  ;;  %v3676_v10 = vld [vmem:[%s5323_s7 + $0x378] sm:$0xff]  ;;  %v3679_v52 = vld [vmem:[%s5323_s7 + $0x390] sm:$0xff] }
 0x3b9   :  { %v3687_v29 = vld [vmem:[%s5323_s7 + $0x3d0] sm:$0xff] }
 0x3ba   :  { %v1931_v54 = vadd.f32 %v4998_v13, %v1889_v21  ;;  %v1932_v19 = vadd.f32 %v5000_v20, %v1902_v53  ;;  %v3667_v20 = vld [vmem:[%s5323_s7 + $0x330] sm:$0xff]  ;;  %v3678_v21 = vld [vmem:[%s5323_s7 + $0x388] sm:$0xff] }
 0x3bb   :  { %v3686_v53 = vld [vmem:[%s5323_s7 + $0x3c8] sm:$0xff] }
 0x3bc   :  { %v1933_v1 = vadd.f32 %v1931_v54, %v4618_v58  ;;  %v1934_v2 = vadd.f32 %v1932_v19, %v4620_v61  ;;  %v3677_v54 = vld [vmem:[%s5323_s7 + $0x380] sm:$0xff] }
 0x3bd   :  { %v3685_v19 = vld [vmem:[%s5323_s7 + $0x3c0] sm:$0xff] }
 0x3be   :  { %v1935_v17 = vmax.f32 %v1933_v1, 0.0  ;;  %v1936_v46 = vmax.f32 %v1934_v2, 0.0  ;;  %v3696_v1 = vld [vmem:[%s5325_s9 + $0x18] sm:$0xff]  ;;  %v3695_v2 = vld [vmem:[%s5325_s9 + $0x10] sm:$0xff] }
 0x3bf   :  { %v1890_v50 = vpop.f32.mrf.mxu0  ;;  %v1903_v44 = vpop.f32.mrf.mxu1 }
 0x3c0   :  { %v1937_v48 = vpack.c.bf16 %v1935_v17, %v1935_v17  ;;  %v1938_v13 = vpack.c.bf16 %v1936_v46, %v1936_v46 }
 0x3c2   :  { %2075 = vmatmul.bf16.vlgmr.msrb.gmra.mxu0 %v1937_v48  ;;  %2088 = vmatmul.bf16.vlgmr.msrb.gmra.mxu1 %v1938_v13 }
 0x3c3   :  { %2312 = vmatpush.bf16.msrb.mxu0 %v3668_v47  ;;  %2325 = vmatpush.bf16.msrb.mxu1 %v3676_v10 }
 0x3c7   :  { %2313 = vmatpush.bf16.msrb.mxu0 %v3667_v20  ;;  %2326 = vmatpush.bf16.msrb.mxu1 %v3675_v42 }
 0x3cb   :  { %2314 = vmatpush.bf16.msrb.mxu0 %v3666_v43  ;;  %2327 = vmatpush.bf16.msrb.mxu1 %v3674_v34 }
 0x3cf   :  { %2315 = vmatpush.bf16.msrb.mxu0 %v3665_v0  ;;  %2328 = vmatpush.bf16.msrb.mxu1 %v3673_v60 }
 0x3d2   :  { %2128 = vmatmul.bf16.vlgmr.msra.gmra.mxu0 %v5363_v45  ;;  %2141 = vmatmul.bf16.vlgmr.msra.gmra.mxu1 %v5363_v45  ;;  %v3670_v45 = vld [vmem:[%s5323_s7 + $0x348] sm:$0xff] }
 0x3d3   :  { %2316 = vmatpush.bf16.msrb.mxu0 %v3664_v6  ;;  %2329 = vmatpush.bf16.msrb.mxu1 %v3672_v14 }
 0x3d7   :  { %2317 = vmatpush.bf16.msrb.mxu0 %v3663_v30  ;;  %2330 = vmatpush.bf16.msrb.mxu1 %v3671_v62 }
 0x3db   :  { %2318 = vmatpush.bf16.msrb.mxu0 %v3662_v22  ;;  %2331 = vmatpush.bf16.msrb.mxu1 %v3670_v45  ;;  %v3694_v22 = vld [vmem:[%s5325_s9 + $0x8] sm:$0xff]  ;;  %v3698_v45 = vld [vmem:[%s5324_s8] ss:$0 sm:$0xff] }
 0x3df   :  { %2319 = vmatpush.bf16.msrb.mxu0 %v3661_v23  ;;  %2332 = vmatpush.bf16.msrb.mxu1 %v3669_v37 }
 0x3e3   :  { %2365 = vmatpush.bf16.msra.mxu0 %v4050_v55  ;;  %2378 = vmatpush.bf16.msra.mxu1 %v4052_v56 }
 0x3e7   :  { %2366 = vmatpush.bf16.msra.mxu0 %v4085_v3  ;;  %2379 = vmatpush.bf16.msra.mxu1 %v4088_v4 }
 0x3eb   :  { %2367 = vmatpush.bf16.msra.mxu0 %v4125_v15  ;;  %2380 = vmatpush.bf16.msra.mxu1 %v4130_v16  ;;  %v3684_v15 = vld [vmem:[%s5323_s7 + $0x3b8] sm:$0xff] }
 0x3ec   :  { %v3692_v16 = vld [vmem:[%s5323_s7 + $0x3f8] sm:$0xff]  ;;  %2525 = vmatpush.bf16.msra.mxu2 %v3684_v15 }
 0x3ed   :  { %2538 = vmatpush.bf16.msra.mxu3 %v3692_v16 }
 0x3ef   :  { %2368 = vmatpush.bf16.msra.mxu0 %v4165_v26  ;;  %2381 = vmatpush.bf16.msra.mxu1 %v4168_v27  ;;  %v3683_v26 = vld [vmem:[%s5323_s7 + $0x3b0] sm:$0xff] }
 0x3f0   :  { %v3691_v27 = vld [vmem:[%s5323_s7 + $0x3f0] sm:$0xff]  ;;  %2526 = vmatpush.bf16.msra.mxu2 %v3683_v26 }
 0x3f1   :  { %2539 = vmatpush.bf16.msra.mxu3 %v3691_v27 }
 0x3f3   :  { %2369 = vmatpush.bf16.msra.mxu0 %v4201_v40  ;;  %2382 = vmatpush.bf16.msra.mxu1 %v4204_v41 }
 0x3f7   :  { %2370 = vmatpush.bf16.msra.mxu0 %v4237_v57  ;;  %2383 = vmatpush.bf16.msra.mxu1 %v4249_v63 }
 0x3fb   :  { %2371 = vmatpush.bf16.msra.mxu0 %v5364_v25  ;;  %2384 = vmatpush.bf16.msra.mxu1 %v5365_v36 }
 0x3ff   :  { %2372 = vmatpush.bf16.msra.mxu0 %v5366_v24  ;;  %2385 = vmatpush.bf16.msra.mxu1 %v5367_v39 }
 0x43f   :  { %v2076_v7 = vpop.f32.mrf.mxu0  ;;  %v2089_v55 = vpop.f32.mrf.mxu1 }
 0x440   :  { %v2090_v8 = vadd.f32 %v2089_v55, %v2076_v7 }
 0x442   :  { %v5227_v56 = vadd.f32 %v2090_v8, %v5152_v5 }
 0x447   :  { %v2078_v3 = vpop.f32.mrf.mxu0  ;;  %v2091_v4 = vpop.f32.mrf.mxu1 }
 0x448   :  { %v3699_v3 = vld [vmem:[%s5326_s10] ss:$0 sm:$0xff] }
 0x44f   :  { %v2129_v40 = vpop.f32.mrf.mxu0  ;;  %v2142_v41 = vpop.f32.mrf.mxu1 }
 0x450   :  { %v2130_v57 = vadd.f32 %v2129_v40, %v5004_v51  ;;  %v2143_v63 = vadd.f32 %v2142_v41, %v5006_v33  ;;  %v3682_v51 = vld [vmem:[%s5323_s7 + $0x3a8] sm:$0xff] }
 0x451   :  { %v3690_v33 = vld [vmem:[%s5323_s7 + $0x3e8] sm:$0xff]  ;;  %2527 = vmatpush.bf16.msra.mxu2 %v3682_v51 }
 0x452   :  { %v2176_v25 = vadd.f32 %v5008_v11, %v2130_v57  ;;  %v2177_v36 = vadd.f32 %v5010_v12, %v2143_v63  ;;  %2540 = vmatpush.bf16.msra.mxu3 %v3690_v33  ;;  %v3681_v11 = vld [vmem:[%s5323_s7 + $0x3a0] sm:$0xff] }
 0x453   :  { %v3689_v12 = vld [vmem:[%s5323_s7 + $0x3e0] sm:$0xff] }
 0x454   :  { %v2178_v24 = vadd.f32 %v2176_v25, %v4618_v58  ;;  %v2179_v39 = vadd.f32 %v2177_v36, %v4620_v61 }
 0x455   :  { %2528 = vmatpush.bf16.msra.mxu2 %v3681_v11 }
 0x456   :  { %v2180_v31 = vmax.f32 %v2178_v24, 0.0  ;;  %v2181_v35 = vmax.f32 %v2179_v39, 0.0  ;;  %2541 = vmatpush.bf16.msra.mxu3 %v3689_v12 }
 0x457   :  { %v2131_v18 = vpop.f32.mrf.mxu0  ;;  %v2144_v38 = vpop.f32.mrf.mxu1 }
 0x458   :  { %v2182_v5 = vpack.c.bf16 %v2180_v31, %v2180_v31  ;;  %v2183_v9 = vpack.c.bf16 %v2181_v35, %v2181_v35 }
 0x45a   :  { %2320 = vmatmul.bf16.vlgmr.msrb.gmra.mxu0 %v2182_v5  ;;  %2333 = vmatmul.bf16.vlgmr.msrb.gmra.mxu1 %v2183_v9 }
 0x45b   :  { %2542 = vmatpush.bf16.msra.mxu3 %v3688_v28  ;;  %2602 = vmatpush.bf16.msrb.mxu0 %v3696_v1 }
 0x45f   :  { %2543 = vmatpush.bf16.msra.mxu3 %v3687_v29  ;;  %2603 = vmatpush.bf16.msrb.mxu0 %v3695_v2 }
 0x463   :  { %2544 = vmatpush.bf16.msra.mxu3 %v3686_v53  ;;  %2604 = vmatpush.bf16.msrb.mxu0 %v3694_v22 }
 0x467   :  { %2545 = vmatpush.bf16.msra.mxu3 %v3685_v19 }
 0x46a   :  { %2373 = vmatmul.bf16.vlgmr.msra.gmra.mxu0 %v4921_v49  ;;  %2386 = vmatmul.bf16.vlgmr.msra.gmra.mxu1 %v4921_v49  ;;  %v3680_v49 = vld [vmem:[%s5323_s7 + $0x398] sm:$0xff] }
 0x46b   :  { %2529 = vmatpush.bf16.msra.mxu2 %v3680_v49 }
 0x46f   :  { %2530 = vmatpush.bf16.msra.mxu2 %v3679_v52 }
 0x473   :  { %2531 = vmatpush.bf16.msra.mxu2 %v3678_v21 }
 0x477   :  { %2532 = vmatpush.bf16.msra.mxu2 %v3677_v54 }
 0x4d7   :  { %v2321_v17 = vpop.f32.mrf.mxu0  ;;  %v2334_v46 = vpop.f32.mrf.mxu1 }
 0x4d8   :  { %v2335_v50 = vadd.f32 %v2334_v46, %v2321_v17 }
 0x4da   :  { %v2338_v44 = vadd.f32 %v2335_v50, %v5227_v56 }
 0x4df   :  { %v2323_v47 = vpop.f32.mrf.mxu0  ;;  %v2336_v10 = vpop.f32.mrf.mxu1 }
 0x4e7   :  { %v2374_v48 = vpop.f32.mrf.mxu0  ;;  %v2387_v13 = vpop.f32.mrf.mxu1 }
 0x4e8   :  { %v2375_v20 = vadd.f32 %v2374_v48, %v5054_v32  ;;  %v2388_v42 = vadd.f32 %v2387_v13, %v5056_v59  ;;  %v3693_v32 = vld [vmem:[%s5325_s9] sm:$0xff]  ;;  %s3726_s9 = smov [#allocation2]  }
 0x4e9   :  { %2605 = vmatpush.bf16.msrb.mxu0 %v3693_v32  ;;  %s2617_s17 = sshll.u32 %s3726_s9, 4  ;;  %s2618_s17 = int_to_ptr.vmem [resolvable:$true] %s2617_s17 }
 0x4ea   :  { %v2391_v43 = vadd.f32 %v2375_v20, %v4618_v58  ;;  %v2392_v34 = vadd.f32 %v2388_v42, %v4620_v61 }
 0x4ec   :  { %v2393_v0 = vmax.f32 %v2391_v43, 0.0  ;;  %v2394_v60 = vmax.f32 %v2392_v34, 0.0 }
 0x4ee   :  { %v2395_v6 = vpack.c.bf16 %v2393_v0, %v2393_v0  ;;  %v2396_v14 = vpack.c.bf16 %v2394_v60, %v2394_v60 }
 0x4ef   :  { %v2376_v30 = vpop.f32.mrf.mxu0  ;;  %v2389_v62 = vpop.f32.mrf.mxu1 }
 0x4f0   :  { %2533 = vmatmul.bf16.vlgmr.msra.gmra.mxu2 %v2395_v6  ;;  %2546 = vmatmul.bf16.vlgmr.msra.gmra.mxu3 %v2396_v14 }
 0x573   :  { %v2534_v58 = vpop.f32.mrf.mxu2  ;;  %v2547_v61 = vpop.f32.mrf.mxu3 }
 0x574   :  { %v2548_v59 = vadd.f32 %v2547_v61, %v2534_v58 }
 0x576   :  { %v2551_v23 = vadd.f32 %v2548_v59, %v2338_v44 }
 0x578   :  { %v2556_v37 = vadd.f32 %v3698_v45, %v2551_v23 }
 0x57a   :  { %v2557_v7 = vmax.f32 %v2556_v37, 0.0 }
 0x57b   :  { %v2536_v55 = vpop.f32.mrf.mxu2  ;;  %v2549_v8 = vpop.f32.mrf.mxu3 }
 0x57c   :  { %v2558_v56 = vpack.c.bf16 %v2557_v7, %v2557_v7 }
 0x57e   :  { %3484 = vmatmul.msk.bf16.vlgmr.msrb.gmra.mxu0 %vm252_vm0, %v2558_v56 }
 0x5fb   :  { %v2607_v4 = vpop.f32.mrf.mxu0 }
 0x5fc   :  { %v2608_v15 = vadd.f32 %v3699_v3, %v2607_v4 }
 0x5fe   :  { %2611 = vst [vmem:[#allocation2] sm:$0xff] %v2608_v15 }
 0x5ff   :  { %2622 = dma.vmem_to_hbm [thread:$0]  %s2618_s17, 128, %s2620_s19, [#allocation3]  }
 0x603   :  { %v2609_v16 = vpop.f32.mrf.mxu0 }
 0x604   :  { %3724 = dma.done.wait [#allocation3], 128  }
 0x605   :  { %3725 = vsyncadd [#allocation3], 4294967168 }
 0x606   :  { %2627 = vsyncpa [#allocation3], 1 }

</bundles_post_ra>
